<compile_context>
chip_gen: v5e
topology: v5e:2x2
jax: 0.10.0
libtpu: 0.0.40
codegen_flags: <defaults>
</compile_context>

<pallas_src>
import functools

import jax
import jax.numpy as jnp
import numpy as np
from jax import lax
from jax.experimental import pallas as pl
from jax.experimental.pallas import tpu as pltpu

_NORM_EPS_SQ = 1e-24  # (F.normalize eps = 1e-12) ** 2, applied to the squared norm


# ---------------------------------------------------------------------------
# In-kernel helpers (plain jnp on VMEM values, all f32)
# ---------------------------------------------------------------------------
def _l2_normalize(x):
    # x * rsqrt(max(sum(x^2), eps^2))  ==  x / max(||x||, eps); rsqrt -> EUP slot.
    sq = jnp.sum(x * x, axis=1, keepdims=True)
    return x * lax.rsqrt(jnp.maximum(sq, _NORM_EPS_SQ))


def _kl_batchmean_two_piece(teacher, student, queue, mom, inv_tt, inv_st):
    """KLDivLoss(log_softmax(student @ [Q;mom].T / st), softmax(teacher @ [Q;mom].T / tt)),
    reduction='batchmean', WITHOUT materializing the concatenated queue: logits
    over the stored queue rows and the current momentum rows are combined with
    a shared max / logsumexp (permutation of the softmax axis is loss-neutral)."""
    dims = (((1,), (1,)), ((), ()))  # 'nc,kc->nk': contract feature dims
    lt_q = lax.dot_general(teacher, queue, dims, preferred_element_type=jnp.float32) * inv_tt
    lt_m = lax.dot_general(teacher, mom, dims, preferred_element_type=jnp.float32) * inv_tt
    ls_q = lax.dot_general(student, queue, dims, preferred_element_type=jnp.float32) * inv_st
    ls_m = lax.dot_general(student, mom, dims, preferred_element_type=jnp.float32) * inv_st

    m_t = jnp.maximum(jnp.max(lt_q, axis=1, keepdims=True),
                      jnp.max(lt_m, axis=1, keepdims=True))
    log_z_t = jnp.log(jnp.sum(jnp.exp(lt_q - m_t), axis=1, keepdims=True)
                      + jnp.sum(jnp.exp(lt_m - m_t), axis=1, keepdims=True))
    m_s = jnp.maximum(jnp.max(ls_q, axis=1, keepdims=True),
                      jnp.max(ls_m, axis=1, keepdims=True))
    log_z_s = jnp.log(jnp.sum(jnp.exp(ls_q - m_s), axis=1, keepdims=True)
                      + jnp.sum(jnp.exp(ls_m - m_s), axis=1, keepdims=True))

    def piece(lt, ls):
        log_p = lt - m_t - log_z_t
        log_q = ls - m_s - log_z_s
        return jnp.sum(jnp.exp(log_p) * (log_p - log_q), axis=1, keepdims=True)

    row = piece(lt_q, ls_q) + piece(lt_m, ls_m)                    # [B, 1]
    return jnp.sum(row, axis=0, keepdims=True) * (1.0 / teacher.shape[0])  # [1, 1]


# ---------------------------------------------------------------------------
# Fused SCTLoss forward kernel (grid over the 3 predictor stages)
# ---------------------------------------------------------------------------
def sct_loss_kernel(emb_ref, w1_ref, b1_ref, w2_ref, b2_ref,
                    qa_hbm, qb_hbm, ptr_ref,
                    loss_ref, qa_out, qb_out,
                    pred_scr, qa_vmem, qb_vmem, mom_a_scr, mom_b_scr,
                    read_sem, write_sem, *,
                    batch, inv_teacher_temp, inv_student_temp):
    stage = pl.program_id(0)
    last = pl.num_programs(0) - 1

    @pl.when(stage == 0)
    def _prologue():
        # Stream both instance queues HBM -> VMEM; they are consumed only at
        # the last stage, so this DMA hides behind the predictor matmuls.
        pltpu.make_async_copy(qa_hbm, qa_vmem, read_sem.at[0]).start()
        pltpu.make_async_copy(qb_hbm, qb_vmem, read_sem.at[1]).start()
        pred_scr[...] = emb_ref[...]

    # Current predictor stage: Linear(D, 10D) -> ReLU -> Linear(10D, D).
    # bf16 operands, f32 accumulation; activations carried in f32 scratch.
    x = pred_scr[...]
    h = jnp.dot(x.astype(jnp.bfloat16), w1_ref[...],
                preferred_element_type=jnp.float32) + b1_ref[...]
    h = jnp.maximum(h, 0.0)
    y = jnp.dot(h.astype(jnp.bfloat16), w2_ref[...],
                preferred_element_type=jnp.float32) + b2_ref[...]
    pred_scr[...] = y

    @pl.when(stage == last)
    def _epilogue():
        rep = _l2_normalize(y)                         # [2B, D]
        rep_a, rep_b = rep[:batch], rep[batch:]
        mom = _l2_normalize(emb_ref[...])              # momentum path (no_grad)
        mom_a, mom_b = mom[:batch], mom[batch:]
        mom_a_scr[...] = mom_a
        mom_b_scr[...] = mom_b

        # Queues are now needed: wait for the stage-0 streaming reads.
        pltpu.make_async_copy(qa_hbm, qa_vmem, read_sem.at[0]).wait()
        pltpu.make_async_copy(qb_hbm, qb_vmem, read_sem.at[1]).wait()

        # ARL_loss_score_A: student = rep_sent_B vs Q_A, teacher = momentum_A
        loss_a = _kl_batchmean_two_piece(mom_a, rep_b, qa_vmem[...], mom_a,
                                         inv_teacher_temp, inv_student_temp)
        # ARL_loss_score_B: student = rep_sent_A vs Q_B, teacher = momentum_B
        loss_b = _kl_batchmean_two_piece(mom_b, rep_a, qb_vmem[...], mom_b,
                                         inv_teacher_temp, inv_student_temp)
        loss_ref[...] = loss_a + loss_b                # (.mean() of a scalar is identity)

        # Circular FIFO update: overwrite the oldest B rows in place at the
        # caller-supplied offset -> O(B*D) HBM writeback instead of O(K*D).
        ptr = ptr_ref[0]
        wa = pltpu.make_async_copy(mom_a_scr, qa_out.at[pl.ds(ptr, batch)], write_sem.at[0])
        wb = pltpu.make_async_copy(mom_b_scr, qb_out.at[pl.ds(ptr, batch)], write_sem.at[1])
        wa.start()
        wb.start()
        wa.wait()
        wb.wait()


def sct_loss_forward(emb_a, emb_b, queue_a, queue_b, queue_ptr, predictor_params,
                     teacher_temp, student_temp):
    B, D = emb_a.shape
    K, _ = queue_a.shape
    H = predictor_params[0][0].shape[1]
    assert D % 128 == 0 and H % 128 == 0, "feature dims must be lane (128) multiples"
    assert B % 8 == 0 and K % 8 == 0, "row counts must be sublane (8) multiples"
    assert K % B == 0, "queue size must be a multiple of the batch (circular writes)"

    # Stack the 3 predictor stages so a grid axis can pipeline their weight DMA
    # against compute; weights in bf16 (half the HBM bytes, native MXU path).
    w1 = jnp.stack([p[0] for p in predictor_params]).astype(jnp.bfloat16)  # [3, D, H]
    b1 = jnp.stack([p[1] for p in predictor_params])                       # [3, 1, H] f32
    w2 = jnp.stack([p[2] for p in predictor_params]).astype(jnp.bfloat16)  # [3, H, D]
    b2 = jnp.stack([p[3] for p in predictor_params])                       # [3, 1, D] f32

    emb = jnp.concatenate([emb_a, emb_b], axis=0)                          # [2B, D]
    ptr = jnp.asarray([queue_ptr], dtype=jnp.int32)

    n_stage = 3
    kernel = functools.partial(
        sct_loss_kernel,
        batch=B,
        inv_teacher_temp=float(1.0 / teacher_temp),
        inv_student_temp=float(1.0 / student_temp))

    flops = 24 * B * D * H + 8 * B * D * (K + B)
    transcendentals = 4 * B * (K + B) + 16 * B
    bytes_accessed = ((w1.size + w2.size) * 2 + (b1.size + b2.size) * 4
                      + emb.size * 4 + 2 * K * D * 4 + 2 * B * D * 4 + 4)

    grid_spec = pltpu.PrefetchScalarGridSpec(
        num_scalar_prefetch=0,
        grid=(n_stage,),
        in_specs=[
            pl.BlockSpec((2 * B, D), lambda s: (0, 0)),            # embeddings (resident)
            pl.BlockSpec((None, D, H), lambda s: (s, 0, 0)),       # stage weight 1 (bf16)
            pl.BlockSpec((None, 1, H), lambda s: (s, 0, 0)),       # stage bias 1
            pl.BlockSpec((None, H, D), lambda s: (s, 0, 0)),       # stage weight 2 (bf16)
            pl.BlockSpec((None, 1, D), lambda s: (s, 0, 0)),       # stage bias 2
            pl.BlockSpec(memory_space=pl.ANY),                     # queue_A (HBM)
            pl.BlockSpec(memory_space=pl.ANY),                     # queue_B (HBM)
            pl.BlockSpec(memory_space=pltpu.MemorySpace.SMEM),     # circular write offset
        ],
        out_specs=(
            pl.BlockSpec((1, 1), lambda s: (0, 0)),                # loss
            pl.BlockSpec(memory_space=pl.ANY),                     # queue_A (aliased, in-place)
            pl.BlockSpec(memory_space=pl.ANY),                     # queue_B (aliased, in-place)
        ),
        scratch_shapes=[
            pltpu.VMEM((2 * B, D), jnp.float32),   # activation carry across stages
            pltpu.VMEM((K, D), jnp.float32),       # queue_A VMEM tile
            pltpu.VMEM((K, D), jnp.float32),       # queue_B VMEM tile
            pltpu.VMEM((B, D), jnp.float32),       # momentum_A rows (DMA source)
            pltpu.VMEM((B, D), jnp.float32),       # momentum_B rows (DMA source)
            pltpu.SemaphoreType.DMA((2,)),         # queue read sems
            pltpu.SemaphoreType.DMA((2,)),         # queue write sems
        ],
    )

    loss, new_queue_a, new_queue_b = pl.pallas_call(
        kernel,
        grid_spec=grid_spec,
        out_shape=(jax.ShapeDtypeStruct((1, 1), jnp.float32),
                   jax.ShapeDtypeStruct((K, D), jnp.float32),
                   jax.ShapeDtypeStruct((K, D), jnp.float32)),
        input_output_aliases={5: 1, 6: 2},
        compiler_params=pltpu.CompilerParams(
            dimension_semantics=("arbitrary",)),
        cost_estimate=pl.CostEstimate(
            flops=flops, transcendentals=transcendentals,
            bytes_accessed=bytes_accessed),
    )(emb, w1, b1, w2, b2, queue_a, queue_b, ptr)

    new_ptr = (queue_ptr + B) % K
    return loss[0, 0], new_queue_a, new_queue_b, new_ptr


# ---------------------------------------------------------------------------
# Deterministic parameter / input construction + pure-JAX reference
# ---------------------------------------------------------------------------
def init_linear(key, fan_in, fan_out):
    kw, kb = jax.random.split(key)
    bound = 1.0 / float(fan_in) ** 0.5
    w = jax.random.uniform(kw, (fan_in, fan_out), jnp.float32, -bound, bound)
    b = jax.random.uniform(kb, (1, fan_out), jnp.float32, -bound, bound)
    return w, b


def init_predictor(key, dim, hidden):
    k1, k2 = jax.random.split(key)
    w1, b1 = init_linear(k1, dim, hidden)   # Linear(dim, 10*dim)
    w2, b2 = init_linear(k2, hidden, dim)   # Linear(10*dim, dim)
    return (w1, b1, w2, b2)


def l2_normalize_ref(x):
    n = jnp.maximum(jnp.sqrt(jnp.sum(x * x, axis=1, keepdims=True)), 1e-12)
    return x / n


def sct_loss_reference(emb_a, emb_b, queue_a, queue_b, params, t_temp, s_temp):
    """Straightforward (torch-shaped) reference, with the same bf16 weight cast."""
    def mlp(x, p):
        w1, b1, w2, b2 = p
        h = jnp.dot(x.astype(jnp.bfloat16), w1.astype(jnp.bfloat16),
                    preferred_element_type=jnp.float32) + b1
        h = jnp.maximum(h, 0.0)
        return jnp.dot(h.astype(jnp.bfloat16), w2.astype(jnp.bfloat16),
                       preferred_element_type=jnp.float32) + b2

    pred = jnp.concatenate([emb_a, emb_b], axis=0)
    for p in params:
        pred = mlp(pred, p)
    rep = l2_normalize_ref(pred)
    B = emb_a.shape[0]
    rep_a, rep_b = rep[:B], rep[B:]
    mom_a = l2_normalize_ref(emb_a)
    mom_b = l2_normalize_ref(emb_b)
    q_a = jnp.concatenate([queue_a, mom_a], axis=0)
    q_b = jnp.concatenate([queue_b, mom_b], axis=0)

    def kl(teacher, student, q):
        lt = teacher @ q.T / t_temp
        ls = student @ q.T / s_temp
        p = jax.nn.softmax(lt, axis=1)
        return jnp.sum(p * (jax.nn.log_softmax(lt, axis=1)
                            - jax.nn.log_softmax(ls, axis=1))) / teacher.shape[0]

    return kl(mom_a, rep_b, q_a) + kl(mom_b, rep_a, q_b)


if __name__ == "__main__":
    # Small, tile-aligned example shapes: D = 128, H = 10*D = 1280, B = 8, K = 128.
    B, D, K = 8, 128, 128
    H = 10 * D
    teacher_temp, student_temp = 0.05, 0.05

    key = jax.random.PRNGKey(0)
    k_p1, k_p2, k_p3, k_a, k_b, k_qa, k_qb = jax.random.split(key, 7)

    predictor_params = [
        init_predictor(k_p1, D, H),   # online_predictor_1
        init_predictor(k_p2, D, H),   # online_predictor_2
        init_predictor(k_p3, D, H),   # online_predictor_3
    ]

    # "model" outputs for the two views of the batch
    emb_a = jax.random.normal(k_a, (B, D), jnp.float32)
    emb_b = jax.random.normal(k_b, (B, D), jnp.float32)

    # instance queues (already-normalized past momentum embeddings)
    queue_a = l2_normalize_ref(jax.random.normal(k_qa, (K, D), jnp.float32))
    queue_b = l2_normalize_ref(jax.random.normal(k_qb, (K, D), jnp.float32))
    queue_ptr = 0

    # Reference computed BEFORE the kernel call (the queue buffers are updated
    # in place / aliased by the kernel).
    ref_loss = sct_loss_reference(emb_a, emb_b, queue_a, queue_b,
                                  predictor_params, teacher_temp, student_temp)
    ref_mom_a = l2_normalize_ref(emb_a)
    ref_mom_b = l2_normalize_ref(emb_b)
    jax.block_until_ready((ref_loss, ref_mom_a, ref_mom_b))

    loss, new_qa, new_qb, new_ptr = sct_loss_forward(
        emb_a, emb_b, queue_a, queue_b, queue_ptr, predictor_params,
        teacher_temp, student_temp)
    jax.block_until_ready((loss, new_qa, new_qb))

    np.testing.assert_allclose(np.asarray(loss), np.asarray(ref_loss),
                               rtol=2e-2, atol=2e-3)
    np.testing.assert_allclose(np.asarray(new_qa[queue_ptr:queue_ptr + B]),
                               np.asarray(ref_mom_a), rtol=1e-4, atol=1e-5)
    np.testing.assert_allclose(np.asarray(new_qb[queue_ptr:queue_ptr + B]),
                               np.asarray(ref_mom_b), rtol=1e-4, atol=1e-5)
    assert new_ptr == (queue_ptr + B) % K

    print("KERNEL_OK")
</pallas_src>

<mosaic_0001>
module attributes {stable_mosaic.version = 11 : i64} {
  func.func @sct_loss_kernel(%arg0: i32, %arg1: memref<16x128xf32, #tpu.memory_space<vmem>>, %arg2: memref<1x128x1280xbf16, #tpu.memory_space<vmem>>, %arg3: memref<1x1x1280xf32, #tpu.memory_space<vmem>>, %arg4: memref<1x1280x128xbf16, #tpu.memory_space<vmem>>, %arg5: memref<1x1x128xf32, #tpu.memory_space<vmem>>, %arg6: memref<128x128xf32, #tpu.memory_space<any>>, %arg7: memref<128x128xf32, #tpu.memory_space<any>>, %arg8: memref<1xi32, #tpu.memory_space<smem>>, %arg9: memref<1x1xf32, #tpu.memory_space<vmem>>, %arg10: memref<128x128xf32, #tpu.memory_space<any>>, %arg11: memref<128x128xf32, #tpu.memory_space<any>>, %arg12: memref<16x128xf32, #tpu.memory_space<vmem>>, %arg13: memref<128x128xf32, #tpu.memory_space<vmem>>, %arg14: memref<128x128xf32, #tpu.memory_space<vmem>>, %arg15: memref<8x128xf32, #tpu.memory_space<vmem>>, %arg16: memref<8x128xf32, #tpu.memory_space<vmem>>, %arg17: memref<2x!tpu.dma_semaphore, #tpu.memory_space<semaphore_mem>>, %arg18: memref<2x!tpu.dma_semaphore, #tpu.memory_space<semaphore_mem>>) attributes {dimension_semantics = [#tpu.dimension_semantics<arbitrary>], iteration_bounds = array<i64: 3>, scalar_prefetch = 0 : i64, scratch_operands = 7 : i64, tpu.core_type = #tpu.core_type<tc>, window_params = [{pipeline_mode = #tpu.pipeline_mode<synchronous>, transform_indices = @transform_0, window_bounds = array<i64: 16, 128>}, {transform_indices = @transform_1, window_bounds = array<i64: 1, 128, 1280>}, {transform_indices = @transform_2, window_bounds = array<i64: 1, 1, 1280>}, {transform_indices = @transform_3, window_bounds = array<i64: 1, 1280, 128>}, {transform_indices = @transform_4, window_bounds = array<i64: 1, 1, 128>}, {}, {}, {transform_indices = @transform_7, window_bounds = array<i64: 1>}, {pipeline_mode = #tpu.pipeline_mode<synchronous>, transform_indices = @transform_8, window_bounds = array<i64: 1, 1>}, {}, {}]} {
    %c0_i32 = arith.constant 0 : i32
    %0 = arith.cmpi eq, %arg0, %c0_i32 : i32
    %1 = arith.extui %0 : i1 to i32
    %c0_i32_0 = arith.constant 0 : i32
    %2 = arith.cmpi ne, %1, %c0_i32_0 : i32
    scf.if %2 {
      %c0_i32_19 = arith.constant 0 : i32
      %26 = tpu.memref_slice %arg17[%c0_i32_19] : memref<2x!tpu.dma_semaphore, #tpu.memory_space<semaphore_mem>> -> memref<1x!tpu.dma_semaphore, #tpu.memory_space<semaphore_mem>>
      %27 = tpu.memref_squeeze %26 : memref<1x!tpu.dma_semaphore, #tpu.memory_space<semaphore_mem>> -> memref<!tpu.dma_semaphore, #tpu.memory_space<semaphore_mem>>
      tpu.enqueue_dma source(%arg6 : memref<128x128xf32, #tpu.memory_space<any>>) target(%arg13 : memref<128x128xf32, #tpu.memory_space<vmem>>) target_semaphore(%27 : memref<!tpu.dma_semaphore, #tpu.memory_space<semaphore_mem>>)
      %c1_i32 = arith.constant 1 : i32
      %28 = tpu.memref_slice %arg17[%c1_i32] : memref<2x!tpu.dma_semaphore, #tpu.memory_space<semaphore_mem>> -> memref<1x!tpu.dma_semaphore, #tpu.memory_space<semaphore_mem>>
      %29 = tpu.memref_squeeze %28 : memref<1x!tpu.dma_semaphore, #tpu.memory_space<semaphore_mem>> -> memref<!tpu.dma_semaphore, #tpu.memory_space<semaphore_mem>>
      tpu.enqueue_dma source(%arg7 : memref<128x128xf32, #tpu.memory_space<any>>) target(%arg14 : memref<128x128xf32, #tpu.memory_space<vmem>>) target_semaphore(%29 : memref<!tpu.dma_semaphore, #tpu.memory_space<semaphore_mem>>)
      %c0_20 = arith.constant 0 : index
      %c0_21 = arith.constant 0 : index
      %30 = vector.load %arg1[%c0_20, %c0_21] : memref<16x128xf32, #tpu.memory_space<vmem>>, vector<16x128xf32>
      %c0_22 = arith.constant 0 : index
      %c0_23 = arith.constant 0 : index
      %31 = vector.load %arg12[%c0_22, %c0_23] : memref<16x128xf32, #tpu.memory_space<vmem>>, vector<16x128xf32>
      tpu.vector_store %arg12[%c0_22, %c0_23], %30 {strides = array<i32>} : memref<16x128xf32, #tpu.memory_space<vmem>>, vector<16x128xf32>,
    } else {
    }
    %c0 = arith.constant 0 : index
    %c0_1 = arith.constant 0 : index
    %3 = vector.load %arg12[%c0, %c0_1] : memref<16x128xf32, #tpu.memory_space<vmem>>, vector<16x128xf32>
    %4 = arith.truncf %3 : vector<16x128xf32> to vector<16x128xbf16>
    %c0_2 = arith.constant 0 : index
    %c0_3 = arith.constant 0 : index
    %c0_4 = arith.constant 0 : index
    %5 = vector.load %arg2[%c0_2, %c0_3, %c0_4] : memref<1x128x1280xbf16, #tpu.memory_space<vmem>>, vector<1x128x1280xbf16>
    %6 = vector.shape_cast %5 : vector<1x128x1280xbf16> to vector<128x1280xbf16>
    %cst = arith.constant dense<0.000000e+00> : vector<16x1280xf32>
    %7 = tpu.matmul %4, %6, %cst {dimension_numbers = #tpu.dot_dimension_numbers<[1], [0], [0], [1], [0, 0, 1, 1], [], []>} : vector<16x128xbf16>, vector<128x1280xbf16>, vector<16x1280xf32> -> vector<16x1280xf32>
    %c0_5 = arith.constant 0 : index
    %c0_6 = arith.constant 0 : index
    %c0_7 = arith.constant 0 : index
    %8 = vector.load %arg3[%c0_5, %c0_6, %c0_7] : memref<1x1x1280xf32, #tpu.memory_space<vmem>>, vector<1x1x1280xf32>
    %9 = vector.shape_cast %8 : vector<1x1x1280xf32> to vector<1x1280xf32>
    %10 = vector.broadcast %9 : vector<1x1280xf32> to vector<16x1280xf32>
    %11 = arith.addf %7, %10 : vector<16x1280xf32>
    %cst_8 = arith.constant 0.000000e+00 : f32
    %12 = vector.broadcast %cst_8 : f32 to vector<16x1280xf32>
    %13 = arith.maximumf %11, %12 : vector<16x1280xf32>
    %14 = arith.truncf %13 : vector<16x1280xf32> to vector<16x1280xbf16>
    %c0_9 = arith.constant 0 : index
    %c0_10 = arith.constant 0 : index
    %c0_11 = arith.constant 0 : index
    %15 = vector.load %arg4[%c0_9, %c0_10, %c0_11] : memref<1x1280x128xbf16, #tpu.memory_space<vmem>>, vector<1x1280x128xbf16>
    %16 = vector.shape_cast %15 : vector<1x1280x128xbf16> to vector<1280x128xbf16>
    %cst_12 = arith.constant dense<0.000000e+00> : vector<16x128xf32>
    %17 = tpu.matmul %14, %16, %cst_12 {dimension_numbers = #tpu.dot_dimension_numbers<[1], [0], [0], [1], [0, 0, 1, 1], [], []>} : vector<16x1280xbf16>, vector<1280x128xbf16>, vector<16x128xf32> -> vector<16x128xf32>
    %c0_13 = arith.constant 0 : index
    %c0_14 = arith.constant 0 : index
    %c0_15 = arith.constant 0 : index
    %18 = vector.load %arg5[%c0_13, %c0_14, %c0_15] : memref<1x1x128xf32, #tpu.memory_space<vmem>>, vector<1x1x128xf32>
    %19 = vector.shape_cast %18 : vector<1x1x128xf32> to vector<1x128xf32>
    %20 = vector.broadcast %19 : vector<1x128xf32> to vector<16x128xf32>
    %21 = arith.addf %17, %20 : vector<16x128xf32>
    %c0_16 = arith.constant 0 : index
    %c0_17 = arith.constant 0 : index
    %22 = vector.load %arg12[%c0_16, %c0_17] : memref<16x128xf32, #tpu.memory_space<vmem>>, vector<16x128xf32>
    tpu.vector_store %arg12[%c0_16, %c0_17], %21 {strides = array<i32>} : memref<16x128xf32, #tpu.memory_space<vmem>>, vector<16x128xf32>,
    %c2_i32 = arith.constant 2 : i32
    %23 = arith.cmpi eq, %arg0, %c2_i32 : i32
    %24 = arith.extui %23 : i1 to i32
    %c0_i32_18 = arith.constant 0 : i32
    %25 = arith.cmpi ne, %24, %c0_i32_18 : i32
    scf.if %25 {
      %26 = arith.mulf %21, %21 : vector<16x128xf32>
      %cst_19 = arith.constant dense<0.000000e+00> : vector<16xf32>
      %27 = vector.multi_reduction <add>, %26, %cst_19 [1] : vector<16x128xf32> to vector<16xf32>
      %28 = vector.shape_cast %27 : vector<16xf32> to vector<16x1xf32>
      %cst_20 = arith.constant 1.000000e-24 : f32
      %29 = vector.broadcast %cst_20 : f32 to vector<16x1xf32>
      %30 = arith.maximumf %28, %29 : vector<16x1xf32>
      %31 = math.rsqrt %30 : vector<16x1xf32>
      %32 = vector.broadcast %31 : vector<16x1xf32> to vector<16x128xf32>
      %33 = arith.mulf %21, %32 : vector<16x128xf32>
      %34 = vector.extract_strided_slice %33 {offsets = [0, 0], sizes = [8, 128], strides = [1, 1]} : vector<16x128xf32> to vector<8x128xf32>
      %35 = vector.extract_strided_slice %33 {offsets = [8, 0], sizes = [8, 128], strides = [1, 1]} : vector<16x128xf32> to vector<8x128xf32>
      %c0_21 = arith.constant 0 : index
      %c0_22 = arith.constant 0 : index
      %36 = vector.load %arg1[%c0_21, %c0_22] : memref<16x128xf32, #tpu.memory_space<vmem>>, vector<16x128xf32>
      %37 = arith.mulf %36, %36 : vector<16x128xf32>
      %cst_23 = arith.constant dense<0.000000e+00> : vector<16xf32>
      %38 = vector.multi_reduction <add>, %37, %cst_23 [1] : vector<16x128xf32> to vector<16xf32>
      %39 = vector.shape_cast %38 : vector<16xf32> to vector<16x1xf32>
      %cst_24 = arith.constant 1.000000e-24 : f32
      %40 = vector.broadcast %cst_24 : f32 to vector<16x1xf32>
      %41 = arith.maximumf %39, %40 : vector<16x1xf32>
      %42 = math.rsqrt %41 : vector<16x1xf32>
      %43 = vector.broadcast %42 : vector<16x1xf32> to vector<16x128xf32>
      %44 = arith.mulf %36, %43 : vector<16x128xf32>
      %45 = vector.extract_strided_slice %44 {offsets = [0, 0], sizes = [8, 128], strides = [1, 1]} : vector<16x128xf32> to vector<8x128xf32>
      %46 = vector.extract_strided_slice %44 {offsets = [8, 0], sizes = [8, 128], strides = [1, 1]} : vector<16x128xf32> to vector<8x128xf32>
      %c0_25 = arith.constant 0 : index
      %c0_26 = arith.constant 0 : index
      %47 = vector.load %arg15[%c0_25, %c0_26] : memref<8x128xf32, #tpu.memory_space<vmem>>, vector<8x128xf32>
      tpu.vector_store %arg15[%c0_25, %c0_26], %45 {strides = array<i32>} : memref<8x128xf32, #tpu.memory_space<vmem>>, vector<8x128xf32>,
      %c0_27 = arith.constant 0 : index
      %c0_28 = arith.constant 0 : index
      %48 = vector.load %arg16[%c0_27, %c0_28] : memref<8x128xf32, #tpu.memory_space<vmem>>, vector<8x128xf32>
      tpu.vector_store %arg16[%c0_27, %c0_28], %46 {strides = array<i32>} : memref<8x128xf32, #tpu.memory_space<vmem>>, vector<8x128xf32>,
      %c0_i32_29 = arith.constant 0 : i32
      %49 = tpu.memref_slice %arg17[%c0_i32_29] : memref<2x!tpu.dma_semaphore, #tpu.memory_space<semaphore_mem>> -> memref<1x!tpu.dma_semaphore, #tpu.memory_space<semaphore_mem>>
      %50 = tpu.memref_squeeze %49 : memref<1x!tpu.dma_semaphore, #tpu.memory_space<semaphore_mem>> -> memref<!tpu.dma_semaphore, #tpu.memory_space<semaphore_mem>>
      tpu.wait_dma2 semaphore(%50 : memref<!tpu.dma_semaphore, #tpu.memory_space<semaphore_mem>>) src(%arg6 : memref<128x128xf32, #tpu.memory_space<any>>) dst(%arg13 : memref<128x128xf32, #tpu.memory_space<vmem>>)
      %c1_i32 = arith.constant 1 : i32
      %51 = tpu.memref_slice %arg17[%c1_i32] : memref<2x!tpu.dma_semaphore, #tpu.memory_space<semaphore_mem>> -> memref<1x!tpu.dma_semaphore, #tpu.memory_space<semaphore_mem>>
      %52 = tpu.memref_squeeze %51 : memref<1x!tpu.dma_semaphore, #tpu.memory_space<semaphore_mem>> -> memref<!tpu.dma_semaphore, #tpu.memory_space<semaphore_mem>>
      tpu.wait_dma2 semaphore(%52 : memref<!tpu.dma_semaphore, #tpu.memory_space<semaphore_mem>>) src(%arg7 : memref<128x128xf32, #tpu.memory_space<any>>) dst(%arg14 : memref<128x128xf32, #tpu.memory_space<vmem>>)
      %c0_30 = arith.constant 0 : index
      %c0_31 = arith.constant 0 : index
      %53 = vector.load %arg13[%c0_30, %c0_31] : memref<128x128xf32, #tpu.memory_space<vmem>>, vector<128x128xf32>
      %cst_32 = arith.constant dense<0.000000e+00> : vector<8x128xf32>
      %54 = tpu.matmul %45, %53, %cst_32 {dimension_numbers = #tpu.dot_dimension_numbers<[1], [1], [0], [0], [0, 0, 1, 0], [], []>} : vector<8x128xf32>, vector<128x128xf32>, vector<8x128xf32> -> vector<8x128xf32>
      %cst_33 = arith.constant 2.000000e+01 : f32
      %55 = vector.broadcast %cst_33 : f32 to vector<8x128xf32>
      %56 = arith.mulf %54, %55 : vector<8x128xf32>
      %cst_34 = arith.constant dense<0.000000e+00> : vector<8x8xf32>
      %57 = tpu.matmul %45, %45, %cst_34 {dimension_numbers = #tpu.dot_dimension_numbers<[1], [1], [0], [0], [0, 0, 1, 0], [], []>} : vector<8x128xf32>, vector<8x128xf32>, vector<8x8xf32> -> vector<8x8xf32>
      %cst_35 = arith.constant 2.000000e+01 : f32
      %58 = vector.broadcast %cst_35 : f32 to vector<8x8xf32>
      %59 = arith.mulf %57, %58 : vector<8x8xf32>
      %cst_36 = arith.constant dense<0.000000e+00> : vector<8x128xf32>
      %60 = tpu.matmul %35, %53, %cst_36 {dimension_numbers = #tpu.dot_dimension_numbers<[1], [1], [0], [0], [0, 0, 1, 0], [], []>} : vector<8x128xf32>, vector<128x128xf32>, vector<8x128xf32> -> vector<8x128xf32>
      %cst_37 = arith.constant 2.000000e+01 : f32
      %61 = vector.broadcast %cst_37 : f32 to vector<8x128xf32>
      %62 = arith.mulf %60, %61 : vector<8x128xf32>
      %cst_38 = arith.constant dense<0.000000e+00> : vector<8x8xf32>
      %63 = tpu.matmul %35, %45, %cst_38 {dimension_numbers = #tpu.dot_dimension_numbers<[1], [1], [0], [0], [0, 0, 1, 0], [], []>} : vector<8x128xf32>, vector<8x128xf32>, vector<8x8xf32> -> vector<8x8xf32>
      %cst_39 = arith.constant 2.000000e+01 : f32
      %64 = vector.broadcast %cst_39 : f32 to vector<8x8xf32>
      %65 = arith.mulf %63, %64 : vector<8x8xf32>
      %cst_40 = arith.constant dense<0xFF800000> : vector<8xf32>
      %66 = vector.multi_reduction <maximumf>, %56, %cst_40 [1] : vector<8x128xf32> to vector<8xf32>
      %67 = vector.shape_cast %66 : vector<8xf32> to vector<8x1xf32>
      %cst_41 = arith.constant dense<0xFF800000> : vector<8xf32>
      %68 = vector.multi_reduction <maximumf>, %59, %cst_41 [1] : vector<8x8xf32> to vector<8xf32>
      %69 = vector.shape_cast %68 : vector<8xf32> to vector<8x1xf32>
      %70 = arith.maximumf %67, %69 : vector<8x1xf32>
      %71 = vector.broadcast %70 : vector<8x1xf32> to vector<8x128xf32>
      %72 = arith.subf %56, %71 : vector<8x128xf32>
      %73 = math.exp %72 : vector<8x128xf32>
      %cst_42 = arith.constant dense<0.000000e+00> : vector<8xf32>
      %74 = vector.multi_reduction <add>, %73, %cst_42 [1] : vector<8x128xf32> to vector<8xf32>
      %75 = vector.shape_cast %74 : vector<8xf32> to vector<8x1xf32>
      %76 = vector.broadcast %70 : vector<8x1xf32> to vector<8x8xf32>
      %77 = arith.subf %59, %76 : vector<8x8xf32>
      %78 = math.exp %77 : vector<8x8xf32>
      %cst_43 = arith.constant dense<0.000000e+00> : vector<8xf32>
      %79 = vector.multi_reduction <add>, %78, %cst_43 [1] : vector<8x8xf32> to vector<8xf32>
      %80 = vector.shape_cast %79 : vector<8xf32> to vector<8x1xf32>
      %81 = arith.addf %75, %80 : vector<8x1xf32>
      %82 = math.log %81 : vector<8x1xf32>
      %cst_44 = arith.constant dense<0xFF800000> : vector<8xf32>
      %83 = vector.multi_reduction <maximumf>, %62, %cst_44 [1] : vector<8x128xf32> to vector<8xf32>
      %84 = vector.shape_cast %83 : vector<8xf32> to vector<8x1xf32>
      %cst_45 = arith.constant dense<0xFF800000> : vector<8xf32>
      %85 = vector.multi_reduction <maximumf>, %65, %cst_45 [1] : vector<8x8xf32> to vector<8xf32>
      %86 = vector.shape_cast %85 : vector<8xf32> to vector<8x1xf32>
      %87 = arith.maximumf %84, %86 : vector<8x1xf32>
      %88 = vector.broadcast %87 : vector<8x1xf32> to vector<8x128xf32>
      %89 = arith.subf %62, %88 : vector<8x128xf32>
      %90 = math.exp %89 : vector<8x128xf32>
      %cst_46 = arith.constant dense<0.000000e+00> : vector<8xf32>
      %91 = vector.multi_reduction <add>, %90, %cst_46 [1] : vector<8x128xf32> to vector<8xf32>
      %92 = vector.shape_cast %91 : vector<8xf32> to vector<8x1xf32>
      %93 = vector.broadcast %87 : vector<8x1xf32> to vector<8x8xf32>
      %94 = arith.subf %65, %93 : vector<8x8xf32>
      %95 = math.exp %94 : vector<8x8xf32>
      %cst_47 = arith.constant dense<0.000000e+00> : vector<8xf32>
      %96 = vector.multi_reduction <add>, %95, %cst_47 [1] : vector<8x8xf32> to vector<8xf32>
      %97 = vector.shape_cast %96 : vector<8xf32> to vector<8x1xf32>
      %98 = arith.addf %92, %97 : vector<8x1xf32>
      %99 = math.log %98 : vector<8x1xf32>
      %100 = vector.broadcast %70 : vector<8x1xf32> to vector<8x128xf32>
      %101 = arith.subf %56, %100 : vector<8x128xf32>
      %102 = vector.broadcast %82 : vector<8x1xf32> to vector<8x128xf32>
      %103 = arith.subf %101, %102 : vector<8x128xf32>
      %104 = vector.broadcast %87 : vector<8x1xf32> to vector<8x128xf32>
      %105 = arith.subf %62, %104 : vector<8x128xf32>
      %106 = vector.broadcast %99 : vector<8x1xf32> to vector<8x128xf32>
      %107 = arith.subf %105, %106 : vector<8x128xf32>
      %108 = math.exp %103 : vector<8x128xf32>
      %109 = arith.subf %103, %107 : vector<8x128xf32>
      %110 = arith.mulf %108, %109 : vector<8x128xf32>
      %cst_48 = arith.constant dense<0.000000e+00> : vector<8xf32>
      %111 = vector.multi_reduction <add>, %110, %cst_48 [1] : vector<8x128xf32> to vector<8xf32>
      %112 = vector.shape_cast %111 : vector<8xf32> to vector<8x1xf32>
      %113 = vector.broadcast %70 : vector<8x1xf32> to vector<8x8xf32>
      %114 = arith.subf %59, %113 : vector<8x8xf32>
      %115 = vector.broadcast %82 : vector<8x1xf32> to vector<8x8xf32>
      %116 = arith.subf %114, %115 : vector<8x8xf32>
      %117 = vector.broadcast %87 : vector<8x1xf32> to vector<8x8xf32>
      %118 = arith.subf %65, %117 : vector<8x8xf32>
      %119 = vector.broadcast %99 : vector<8x1xf32> to vector<8x8xf32>
      %120 = arith.subf %118, %119 : vector<8x8xf32>
      %121 = math.exp %116 : vector<8x8xf32>
      %122 = arith.subf %116, %120 : vector<8x8xf32>
      %123 = arith.mulf %121, %122 : vector<8x8xf32>
      %cst_49 = arith.constant dense<0.000000e+00> : vector<8xf32>
      %124 = vector.multi_reduction <add>, %123, %cst_49 [1] : vector<8x8xf32> to vector<8xf32>
      %125 = vector.shape_cast %124 : vector<8xf32> to vector<8x1xf32>
      %126 = arith.addf %112, %125 : vector<8x1xf32>
      %cst_50 = arith.constant dense<0.000000e+00> : vector<1xf32>
      %127 = vector.multi_reduction <add>, %126, %cst_50 [0] : vector<8x1xf32> to vector<1xf32>
      %128 = vector.shape_cast %127 : vector<1xf32> to vector<1x1xf32>
      %cst_51 = arith.constant 1.250000e-01 : f32
      %129 = vector.broadcast %cst_51 : f32 to vector<1x1xf32>
      %130 = arith.mulf %128, %129 : vector<1x1xf32>
      %c0_52 = arith.constant 0 : index
      %c0_53 = arith.constant 0 : index
      %131 = vector.load %arg14[%c0_52, %c0_53] : memref<128x128xf32, #tpu.memory_space<vmem>>, vector<128x128xf32>
      %cst_54 = arith.constant dense<0.000000e+00> : vector<8x128xf32>
      %132 = tpu.matmul %46, %131, %cst_54 {dimension_numbers = #tpu.dot_dimension_numbers<[1], [1], [0], [0], [0, 0, 1, 0], [], []>} : vector<8x128xf32>, vector<128x128xf32>, vector<8x128xf32> -> vector<8x128xf32>
      %cst_55 = arith.constant 2.000000e+01 : f32
      %133 = vector.broadcast %cst_55 : f32 to vector<8x128xf32>
      %134 = arith.mulf %132, %133 : vector<8x128xf32>
      %cst_56 = arith.constant dense<0.000000e+00> : vector<8x8xf32>
      %135 = tpu.matmul %46, %46, %cst_56 {dimension_numbers = #tpu.dot_dimension_numbers<[1], [1], [0], [0], [0, 0, 1, 0], [], []>} : vector<8x128xf32>, vector<8x128xf32>, vector<8x8xf32> -> vector<8x8xf32>
      %cst_57 = arith.constant 2.000000e+01 : f32
      %136 = vector.broadcast %cst_57 : f32 to vector<8x8xf32>
      %137 = arith.mulf %135, %136 : vector<8x8xf32>
      %cst_58 = arith.constant dense<0.000000e+00> : vector<8x128xf32>
      %138 = tpu.matmul %34, %131, %cst_58 {dimension_numbers = #tpu.dot_dimension_numbers<[1], [1], [0], [0], [0, 0, 1, 0], [], []>} : vector<8x128xf32>, vector<128x128xf32>, vector<8x128xf32> -> vector<8x128xf32>
      %cst_59 = arith.constant 2.000000e+01 : f32
      %139 = vector.broadcast %cst_59 : f32 to vector<8x128xf32>
      %140 = arith.mulf %138, %139 : vector<8x128xf32>
      %cst_60 = arith.constant dense<0.000000e+00> : vector<8x8xf32>
      %141 = tpu.matmul %34, %46, %cst_60 {dimension_numbers = #tpu.dot_dimension_numbers<[1], [1], [0], [0], [0, 0, 1, 0], [], []>} : vector<8x128xf32>, vector<8x128xf32>, vector<8x8xf32> -> vector<8x8xf32>
      %cst_61 = arith.constant 2.000000e+01 : f32
      %142 = vector.broadcast %cst_61 : f32 to vector<8x8xf32>
      %143 = arith.mulf %141, %142 : vector<8x8xf32>
      %cst_62 = arith.constant dense<0xFF800000> : vector<8xf32>
      %144 = vector.multi_reduction <maximumf>, %134, %cst_62 [1] : vector<8x128xf32> to vector<8xf32>
      %145 = vector.shape_cast %144 : vector<8xf32> to vector<8x1xf32>
      %cst_63 = arith.constant dense<0xFF800000> : vector<8xf32>
      %146 = vector.multi_reduction <maximumf>, %137, %cst_63 [1] : vector<8x8xf32> to vector<8xf32>
      %147 = vector.shape_cast %146 : vector<8xf32> to vector<8x1xf32>
      %148 = arith.maximumf %145, %147 : vector<8x1xf32>
      %149 = vector.broadcast %148 : vector<8x1xf32> to vector<8x128xf32>
      %150 = arith.subf %134, %149 : vector<8x128xf32>
      %151 = math.exp %150 : vector<8x128xf32>
      %cst_64 = arith.constant dense<0.000000e+00> : vector<8xf32>
      %152 = vector.multi_reduction <add>, %151, %cst_64 [1] : vector<8x128xf32> to vector<8xf32>
      %153 = vector.shape_cast %152 : vector<8xf32> to vector<8x1xf32>
      %154 = vector.broadcast %148 : vector<8x1xf32> to vector<8x8xf32>
      %155 = arith.subf %137, %154 : vector<8x8xf32>
      %156 = math.exp %155 : vector<8x8xf32>
      %cst_65 = arith.constant dense<0.000000e+00> : vector<8xf32>
      %157 = vector.multi_reduction <add>, %156, %cst_65 [1] : vector<8x8xf32> to vector<8xf32>
      %158 = vector.shape_cast %157 : vector<8xf32> to vector<8x1xf32>
      %159 = arith.addf %153, %158 : vector<8x1xf32>
      %160 = math.log %159 : vector<8x1xf32>
      %cst_66 = arith.constant dense<0xFF800000> : vector<8xf32>
      %161 = vector.multi_reduction <maximumf>, %140, %cst_66 [1] : vector<8x128xf32> to vector<8xf32>
      %162 = vector.shape_cast %161 : vector<8xf32> to vector<8x1xf32>
      %cst_67 = arith.constant dense<0xFF800000> : vector<8xf32>
      %163 = vector.multi_reduction <maximumf>, %143, %cst_67 [1] : vector<8x8xf32> to vector<8xf32>
      %164 = vector.shape_cast %163 : vector<8xf32> to vector<8x1xf32>
      %165 = arith.maximumf %162, %164 : vector<8x1xf32>
      %166 = vector.broadcast %165 : vector<8x1xf32> to vector<8x128xf32>
      %167 = arith.subf %140, %166 : vector<8x128xf32>
      %168 = math.exp %167 : vector<8x128xf32>
      %cst_68 = arith.constant dense<0.000000e+00> : vector<8xf32>
      %169 = vector.multi_reduction <add>, %168, %cst_68 [1] : vector<8x128xf32> to vector<8xf32>
      %170 = vector.shape_cast %169 : vector<8xf32> to vector<8x1xf32>
      %171 = vector.broadcast %165 : vector<8x1xf32> to vector<8x8xf32>
      %172 = arith.subf %143, %171 : vector<8x8xf32>
      %173 = math.exp %172 : vector<8x8xf32>
      %cst_69 = arith.constant dense<0.000000e+00> : vector<8xf32>
      %174 = vector.multi_reduction <add>, %173, %cst_69 [1] : vector<8x8xf32> to vector<8xf32>
      %175 = vector.shape_cast %174 : vector<8xf32> to vector<8x1xf32>
      %176 = arith.addf %170, %175 : vector<8x1xf32>
      %177 = math.log %176 : vector<8x1xf32>
      %178 = vector.broadcast %148 : vector<8x1xf32> to vector<8x128xf32>
      %179 = arith.subf %134, %178 : vector<8x128xf32>
      %180 = vector.broadcast %160 : vector<8x1xf32> to vector<8x128xf32>
      %181 = arith.subf %179, %180 : vector<8x128xf32>
      %182 = vector.broadcast %165 : vector<8x1xf32> to vector<8x128xf32>
      %183 = arith.subf %140, %182 : vector<8x128xf32>
      %184 = vector.broadcast %177 : vector<8x1xf32> to vector<8x128xf32>
      %185 = arith.subf %183, %184 : vector<8x128xf32>
      %186 = math.exp %181 : vector<8x128xf32>
      %187 = arith.subf %181, %185 : vector<8x128xf32>
      %188 = arith.mulf %186, %187 : vector<8x128xf32>
      %cst_70 = arith.constant dense<0.000000e+00> : vector<8xf32>
      %189 = vector.multi_reduction <add>, %188, %cst_70 [1] : vector<8x128xf32> to vector<8xf32>
      %190 = vector.shape_cast %189 : vector<8xf32> to vector<8x1xf32>
      %191 = vector.broadcast %148 : vector<8x1xf32> to vector<8x8xf32>
      %192 = arith.subf %137, %191 : vector<8x8xf32>
      %193 = vector.broadcast %160 : vector<8x1xf32> to vector<8x8xf32>
      %194 = arith.subf %192, %193 : vector<8x8xf32>
      %195 = vector.broadcast %165 : vector<8x1xf32> to vector<8x8xf32>
      %196 = arith.subf %143, %195 : vector<8x8xf32>
      %197 = vector.broadcast %177 : vector<8x1xf32> to vector<8x8xf32>
      %198 = arith.subf %196, %197 : vector<8x8xf32>
      %199 = math.exp %194 : vector<8x8xf32>
      %200 = arith.subf %194, %198 : vector<8x8xf32>
      %201 = arith.mulf %199, %200 : vector<8x8xf32>
      %cst_71 = arith.constant dense<0.000000e+00> : vector<8xf32>
      %202 = vector.multi_reduction <add>, %201, %cst_71 [1] : vector<8x8xf32> to vector<8xf32>
      %203 = vector.shape_cast %202 : vector<8xf32> to vector<8x1xf32>
      %204 = arith.addf %190, %203 : vector<8x1xf32>
      %cst_72 = arith.constant dense<0.000000e+00> : vector<1xf32>
      %205 = vector.multi_reduction <add>, %204, %cst_72 [0] : vector<8x1xf32> to vector<1xf32>
      %206 = vector.shape_cast %205 : vector<1xf32> to vector<1x1xf32>
      %cst_73 = arith.constant 1.250000e-01 : f32
      %207 = vector.broadcast %cst_73 : f32 to vector<1x1xf32>
      %208 = arith.mulf %206, %207 : vector<1x1xf32>
      %209 = arith.addf %130, %208 : vector<1x1xf32>
      %c0_74 = arith.constant 0 : index
      %c0_75 = arith.constant 0 : index
      %210 = vector.load %arg9[%c0_74, %c0_75] : memref<1x1xf32, #tpu.memory_space<vmem>>, vector<1x1xf32>
      tpu.vector_store %arg9[%c0_74, %c0_75], %209 {strides = array<i32>} : memref<1x1xf32, #tpu.memory_space<vmem>>, vector<1x1xf32>,
      %c0_76 = arith.constant 0 : index
      %211 = memref.load %arg8[%c0_76] : memref<1xi32, #tpu.memory_space<smem>>
      %c0_i32_77 = arith.constant 0 : i32
      %c0_i32_78 = arith.constant 0 : i32
      %212 = tpu.memref_slice %arg10[%211, %c0_i32_78] : memref<128x128xf32, #tpu.memory_space<any>> -> memref<8x128xf32, #tpu.memory_space<any>>
      %213 = tpu.memref_slice %arg18[%c0_i32_77] : memref<2x!tpu.dma_semaphore, #tpu.memory_space<semaphore_mem>> -> memref<1x!tpu.dma_semaphore, #tpu.memory_space<semaphore_mem>>
      %214 = tpu.memref_squeeze %213 : memref<1x!tpu.dma_semaphore, #tpu.memory_space<semaphore_mem>> -> memref<!tpu.dma_semaphore, #tpu.memory_space<semaphore_mem>>
      tpu.enqueue_dma source(%arg15 : memref<8x128xf32, #tpu.memory_space<vmem>>) target(%212 : memref<8x128xf32, #tpu.memory_space<any>>) target_semaphore(%214 : memref<!tpu.dma_semaphore, #tpu.memory_space<semaphore_mem>>)
      %c1_i32_79 = arith.constant 1 : i32
      %c0_i32_80 = arith.constant 0 : i32
      %215 = tpu.memref_slice %arg11[%211, %c0_i32_80] : memref<128x128xf32, #tpu.memory_space<any>> -> memref<8x128xf32, #tpu.memory_space<any>>
      %216 = tpu.memref_slice %arg18[%c1_i32_79] : memref<2x!tpu.dma_semaphore, #tpu.memory_space<semaphore_mem>> -> memref<1x!tpu.dma_semaphore, #tpu.memory_space<semaphore_mem>>
      %217 = tpu.memref_squeeze %216 : memref<1x!tpu.dma_semaphore, #tpu.memory_space<semaphore_mem>> -> memref<!tpu.dma_semaphore, #tpu.memory_space<semaphore_mem>>
      tpu.enqueue_dma source(%arg16 : memref<8x128xf32, #tpu.memory_space<vmem>>) target(%215 : memref<8x128xf32, #tpu.memory_space<any>>) target_semaphore(%217 : memref<!tpu.dma_semaphore, #tpu.memory_space<semaphore_mem>>)
      %c0_i32_81 = arith.constant 0 : i32
      %c0_i32_82 = arith.constant 0 : i32
      %218 = tpu.memref_slice %arg10[%211, %c0_i32_82] : memref<128x128xf32, #tpu.memory_space<any>> -> memref<8x128xf32, #tpu.memory_space<any>>
      %219 = tpu.memref_slice %arg18[%c0_i32_81] : memref<2x!tpu.dma_semaphore, #tpu.memory_space<semaphore_mem>> -> memref<1x!tpu.dma_semaphore, #tpu.memory_space<semaphore_mem>>
      %220 = tpu.memref_squeeze %219 : memref<1x!tpu.dma_semaphore, #tpu.memory_space<semaphore_mem>> -> memref<!tpu.dma_semaphore, #tpu.memory_space<semaphore_mem>>
      tpu.wait_dma2 semaphore(%220 : memref<!tpu.dma_semaphore, #tpu.memory_space<semaphore_mem>>) src(%arg15 : memref<8x128xf32, #tpu.memory_space<vmem>>) dst(%218 : memref<8x128xf32, #tpu.memory_space<any>>)
      %c1_i32_83 = arith.constant 1 : i32
      %c0_i32_84 = arith.constant 0 : i32
      %221 = tpu.memref_slice %arg11[%211, %c0_i32_84] : memref<128x128xf32, #tpu.memory_space<any>> -> memref<8x128xf32, #tpu.memory_space<any>>
      %222 = tpu.memref_slice %arg18[%c1_i32_83] : memref<2x!tpu.dma_semaphore, #tpu.memory_space<semaphore_mem>> -> memref<1x!tpu.dma_semaphore, #tpu.memory_space<semaphore_mem>>
      %223 = tpu.memref_squeeze %222 : memref<1x!tpu.dma_semaphore, #tpu.memory_space<semaphore_mem>> -> memref<!tpu.dma_semaphore, #tpu.memory_space<semaphore_mem>>
      tpu.wait_dma2 semaphore(%223 : memref<!tpu.dma_semaphore, #tpu.memory_space<semaphore_mem>>) src(%arg16 : memref<8x128xf32, #tpu.memory_space<vmem>>) dst(%221 : memref<8x128xf32, #tpu.memory_space<any>>)
    } else {
    }
    return
  }
  func.func @transform_0(%arg0: i32) -> (i32, i32) {
    %c0_i32 = arith.constant 0 : i32
    %c0_i32_0 = arith.constant 0 : i32
    %c0_i32_1 = arith.constant 0 : i32
    return %c0_i32, %c0_i32_0 : i32, i32
  }
  func.func @transform_1(%arg0: i32) -> (i32, i32, i32) {
    %c0_i32 = arith.constant 0 : i32
    %c0_i32_0 = arith.constant 0 : i32
    %c0_i32_1 = arith.constant 0 : i32
    return %arg0, %c0_i32, %c0_i32_0 : i32, i32, i32
  }
  func.func @transform_2(%arg0: i32) -> (i32, i32, i32) {
    %c0_i32 = arith.constant 0 : i32
    %c0_i32_0 = arith.constant 0 : i32
    %c0_i32_1 = arith.constant 0 : i32
    return %arg0, %c0_i32, %c0_i32_0 : i32, i32, i32
  }
  func.func @transform_3(%arg0: i32) -> (i32, i32, i32) {
    %c0_i32 = arith.constant 0 : i32
    %c0_i32_0 = arith.constant 0 : i32
    %c0_i32_1 = arith.constant 0 : i32
    return %arg0, %c0_i32, %c0_i32_0 : i32, i32, i32
  }
  func.func @transform_4(%arg0: i32) -> (i32, i32, i32) {
    %c0_i32 = arith.constant 0 : i32
    %c0_i32_0 = arith.constant 0 : i32
    %c0_i32_1 = arith.constant 0 : i32
    return %arg0, %c0_i32, %c0_i32_0 : i32, i32, i32
  }
  func.func @transform_7(%arg0: i32) -> i32 {
    %c0_i32 = arith.constant 0 : i32
    %c0_i32_0 = arith.constant 0 : i32
    return %c0_i32 : i32
  }
  func.func @transform_8(%arg0: i32) -> (i32, i32) {
    %c0_i32 = arith.constant 0 : i32
    %c0_i32_0 = arith.constant 0 : i32
    %c0_i32_1 = arith.constant 0 : i32
    return %c0_i32, %c0_i32_0 : i32, i32
  }
}

</mosaic_0001>

<bundles_post_ra>
// kernel: tpu_custom_call.1
= control target key start
LH: loop header
LB: loop body
LE: loop exit
PB: predicated region body
PF: predicated region fallthrough
CT: control target
= control target key end

     0   :  { %s4156_s0 = inlined_call_operand.vmem [shape: f32[16,128], index: 0, kind: input, shape index: {}]   ;;  %s4157_s1 = inlined_call_operand.hbm [shape: bf16[3,128,1280], index: 1, kind: input, shape index: {}]   ;;  %s4158_s2 = inlined_call_operand.vmem [shape: f32[3,1,1280], index: 2, kind: input, shape index: {}]   ;;  %s4159_s3 = inlined_call_operand.hbm [shape: bf16[3,1280,128], index: 3, kind: input, shape index: {}]   ;;  %s4160_s4 = inlined_call_operand.vmem [shape: f32[3,1,128], index: 4, kind: input, shape index: {}]   ;;  %s4161_s5 = inlined_call_operand.hbm [shape: f32[128,128], index: 5, kind: input, shape index: {}, may-alias: {5,9}]   ;;  %s4162_s6 = inlined_call_operand.hbm [shape: f32[128,128], index: 6, kind: input, shape index: {}, may-alias: {6,10}]   ;;  %s4163_s7 = inlined_call_operand.<no memory space> [shape: s32[1], index: 7, kind: input, shape index: {}]   ;;  %s4164_s8 = inlined_call_operand.hbm [shape: f32[1,1], index: 8, kind: output, shape index: {0}]   ;;  %s4165_s9 = inlined_call_operand.hbm [shape: f32[128,128], index: 9, kind: output, shape index: {1}, may-alias: {5,9}]   ;;  %s4166_s10 = inlined_call_operand.hbm [shape: f32[128,128], index: 10, kind: output, shape index: {2}, may-alias: {6,10}]  }
   0x1   :  { %4172 = sst [smem:[#allocation36_spill]] %s4157_s1 }
   0x2   :  { %16 = sst [smem:[#allocation9]] %s4163_s7 }
   0x3   :  { %17 = vsyncpa [#allocation11], 0 }
   0x4   :  { %19 = vsyncpa [#allocation11 + $0x1], 0 }
   0x5   :  { %20 = vsyncpa [#allocation14], 0 }
   0x6   :  { %22 = vsyncpa [#allocation14 + $0x1], 0 }
   0x7   :  { %23 = vsyncpa [#allocation12], 0  ;;  %s3636_s15 = smov 0   ;;  %s3638_s16 = smov 0  }
   0x8   :  { %s3640_s17 = smov 0   ;;  %s3642_s18 = smov 0  }
   0x9 LB: > { %4173 = sst [smem:[#allocation33_spill]] %s3563_s17  ;;  %s3655_s7 = sadd.s32 4294967295, %s3567_s18   ;;  %s3567_s18 = sphi %s3642_s18, %s4182_s18   ;;  %s3563_s17 = sphi %s3640_s17, %s4184_s17   ;;  %s3559_s16 = sphi %s3638_s16, %s4186_s16   ;;  %s3555_s15 = sphi %s3636_s15, %s4185_s15  }
   0xa   : > { %s3658_s19 = sadd.s32 1, %s3567_s18   ;;  %s57_s21 = sadd.s32 1, %s3563_s17 }
   0xb   : > { %4174 = sst [smem:[#allocation34_spill]] %s3658_s19  ;;  %s54_s20 = ssub.s32 %s3567_s18, %s3658_s19 }
   0xc   : > { %p55_p0 = scmp.eq.s32.totalorder %s54_s20, 0  ;;  %p64_p1 = scmp.ne.s32.totalorder %s3563_s17, %s3559_s16 }
   0xd   : > { %p65_p2 = scmp.eq.s32.totalorder %s3567_s18, 0  ;;  %p70_p3 = scmp.ne.s32.totalorder %s3559_s16, %s3555_s15 }
   0xe   : > { %s3668_s22 = scalar_select %p55_p0, %s3563_s17, %s57_s21  }
   0xf   : > { %p66_p4 = por %p65_p2, %p64_p1  ;;  %p71_p5 = scmp.eq.s32.totalorder %s3655_s7, 0 }
  0x10   : > { %4175 = sst [smem:[#allocation35_spill]] %s3668_s22  ;;  %p3248_p6 = scmp.lt.s32.totalorder %s3567_s18, 3 }
  0x11   : > { %p3672_p7 = por %p71_p5, %p70_p3  ;;  %s3677_s24 = sand.u32 1, %s3563_s17  }
  0x12   : > { %s4167_s25 = smul.u32 640, %s3677_s24  ;;  %p3681_p8 = pnand %p3248_p6, %p66_p4 }
  0x13   : > { %s4168_s26 = smul.u32 640, %s3567_s18  ;;  %s4178_s1 = sld [smem:[#allocation36_spill]] }
  0x14   : > { %s224_s11 = scalar_lea.vmem [#allocation10], %s4167_s25  ;;  %p2416_p9 = scmp.ge.s32.totalorder %s3567_s18, 1 }
  0x15   : > { %s232_s12 = sshll.u32 %s224_s11, 4  ;;  %s221_s14 = scalar_lea.sflag [#allocation11], %s3677_s24  ;;  %s233_s12 = int_to_ptr.vmem [resolvable:$true] %s232_s12 }
  0x16   : > { %p3337_p11 = pneg %p3681_p8 }
  0x19   : > { %s229_s30 = scalar_lea.hbm %s4178_s1, %s4168_s26  ;;  %s3340_s29 = scalar_lea.hbm %s4178_s1, 1920 }
  0x1a   : > { %s230_s13 = sshll.u32 %s229_s30, 4  ;;  %s231_s13 = int_to_ptr.hbm [resolvable:$true] %s230_s13 }
  0x1b   : > { %s3333_s15 = sshra.s32 %s231_s13, 4  ;;  %s3334_s15 = int_to_ptr.hbm [resolvable:$true] %s3333_s15 }
  0x1c   : > { %s3335_s20 = scalar_lea.hbm %s3334_s15, 640  ;;  %p3341_p0 = scmp.lt.s32.totalorder %s3334_s15, %s4178_s1 }
  0x1d   : > { %p3336_p10 = scmp.ne.s32.totalorder %s3334_s15, %s3335_s20  ;;  %p3342_p1 = scmp.lt.s32.totalorder %s3340_s29, %s3335_s20 }
  0x1f   : > { %p3338_p12 = pnand %p3337_p11, %p3336_p10  ;;  %p3343_p2 = por %p3342_p1, %p3341_p0 }
  0x21   : > { %p3339_p13 = pneg %p3338_p12 }
  0x23   : > { %p3344_p3 = pnand %p3343_p2, %p3339_p13 }
  0x25   : > { %3347 = shalt.err (!%p3344_p3)
}
  0x26   : > { %s3569_s25 = smov 640   ;;  %s3570_s26 = smov 40  }
  0x27   : > { %3244 = dma.hbm_to_vmem [thread:$0]  (!%p3681_p8), %s231_s13, 10240, %s233_s12, %s221_s14, %s3569_s25, %s3569_s25, %s3570_s26  }
  0x28   : > { %p275_p4 = scmp.lt.s32.totalorder %s3567_s18, 4  ;;  %s4179_s21 = smul.u32 640, %s3567_s18 }
  0x29   : > { %s4181_s30 = smul.u32 640, %s3677_s24  ;;  %s250_s17 = scalar_lea.sflag [#allocation14], %s3677_s24 }
  0x2a   : > { %s258_s15 = scalar_lea.hbm %s4159_s3, %s4179_s21  ;;  %p3715_p5 = pnand %p2416_p9, %p275_p4 }
  0x2b   : > { %s259_s29 = sshll.u32 %s258_s15, 4  ;;  %s253_s1 = scalar_lea.vmem [#allocation13], %s4181_s30  ;;  %s260_s29 = int_to_ptr.hbm [resolvable:$true] %s259_s29 }
  0x2c   : > { %s261_s22 = sshll.u32 %s253_s1, 4  ;;  %s3363_s19 = sshra.s32 %s260_s29, 4  ;;  %s262_s22 = int_to_ptr.vmem [resolvable:$true] %s261_s22  ;;  %s3364_s19 = int_to_ptr.hbm [resolvable:$true] %s3363_s19 }
  0x2d   : > { %s3365_s25 = scalar_lea.hbm %s3364_s19, 640  ;;  %s3370_s12 = scalar_lea.hbm %s4159_s3, 1920 }
  0x2e   : > { %p3366_p6 = scmp.ne.s32.totalorder %s3364_s19, %s3365_s25  ;;  %p3371_p9 = scmp.lt.s32.totalorder %s3364_s19, %s4159_s3 }
  0x2f   : > { %p3372_p13 = scmp.lt.s32.totalorder %s3370_s12, %s3365_s25 }
  0x30   : > { %p3368_p10 = pnand %p3366_p6, %p3337_p11 }
  0x31   : > { %p3373_p0 = por %p3372_p13, %p3371_p9 }
  0x32   : > { %p3369_p12 = pneg %p3368_p10 }
  0x34   : > { %p3374_p1 = pnand %p3373_p0, %p3369_p12 }
  0x36   : > { %3377 = shalt.err (!%p3374_p1)
}
  0x37   : > { %s3571_s1 = smov 64   ;;  %s3572_s24 = smov 4  }
  0x38   : > { %3247 = dma.hbm_to_vmem [thread:$0]  (!%p3681_p8), %s260_s29, 10240, %s262_s22, %s250_s17, %s3571_s1, %s3571_s1, %s3572_s24  }
  0x39   : > { %279 = sbr.rel (%p3715_p5) target bundleno = 1238 (0x4d6), region = 44  ;;  %s281_s21 = sand.u32 (!%p3715_p5), 1, %s3559_s16  }
  0x3a   : > { %s3231_s28 = smul.u32 (!%p3715_p5), 640, %s281_s21  ;;  %s282_s11 = scalar_lea.sflag (!%p3715_p5), [#allocation11], %s281_s21 }
  0x3c   : > { %s3736_s15 = scalar_lea.vmem (!%p3715_p5), [#allocation10], %s3231_s28 }
  0x3e   : > { %3534 = dma.done.wait (%p3672_p7), %s282_s11, 10240  }
  0x3f   : > { %3536 = vsyncadd (%p3672_p7), %s282_s11, 4294957056  ;;  %s292_s19 = scalar_lea.sflag [#allocation14], %s281_s21  ;;  %s3742_s30 = scalar_lea.vmem [#allocation13], %s3231_s28 }
  0x40   : > { %3538 = dma.done.wait (%p3672_p7), %s292_s19, 10240  }
  0x41   : > { %3540 = vsyncadd (%p3672_p7), %s292_s19, 4294957056  ;;  %p332_p8 = scmp.lt.s32.totalorder %s3655_s7, 2  ;;  %p2417_p11 = scmp.ne.s32.totalorder %s3655_s7, 0 }
  0x42   : > { %s350_s13 = sshll.u32 (!%p2417_p11), %s4161_s5, 4  ;;  %s3573_s28 = smov (!%p2417_p11), [#allocation3]   ;;  %s351_s13 = int_to_ptr.hbm [resolvable:$true] %s350_s13 }
  0x43   : > { %s3750_s17 = scalar_select %p332_p8, %s3655_s7, 2 }
  0x44   : > { %342 = sbr.rel (%p2417_p11) target bundleno = 76 (0x4c), region = 56  ;;  %s352_s11 = sshll.u32 (!%p2417_p11), %s3573_s28, 4  ;;  %s353_s11 = int_to_ptr.vmem [resolvable:$true] %s352_s11 }
  0x45   : > { %s3232_s22 = smul.u32 10, %s3750_s17  ;;  %s338_s29 = scalar_lea.vmem %s4160_s4, %s3750_s17 }
  0x46   : > { %s364_s27 = sshll.u32 (!%p2417_p11), %s4162_s6, 4  ;;  %s3574_s20 = smov (!%p2417_p11), [#allocation4]   ;;  %s365_s27 = int_to_ptr.hbm [resolvable:$true] %s364_s27 }
  0x47   : > { %s3760_s26 = scalar_lea.vmem %s4158_s2, %s3232_s22  ;;  %s366_s25 = sshll.u32 (!%p2417_p11), %s3574_s20, 4  ;;  %s367_s25 = int_to_ptr.vmem [resolvable:$true] %s366_s25 }
  0x48   : > { %355 = dma.hbm_to_vmem [thread:$0]  (!%p2417_p11), %s351_s13, 2048, %s353_s11, [#allocation7] }
  0x49   : > { %v370_v0 = vld [vmem:[%s4156_s0] sm:$0xff]  ;;  %v371_v1 = vld [vmem:[%s4156_s0 + $0x8] sm:$0xff]  ;;  %369 = dma.hbm_to_vmem [thread:$0]  %s365_s27, 2048, %s367_s25, [#allocation7 + $0x1] }
  0x4a   : > { %372 = vst [vmem:[#allocation2] sm:$0xff] %v370_v0 }
  0x4b   : > { %373 = vst [vmem:[#allocation2 + $0x8] sm:$0xff] %v371_v1 }
  0x4c PF: > { %v2700_v2 = vld [vmem:[%s3736_s15 + $0x230] sm:$0xf]  ;;  %v3142_v3 = vld [vmem:[%s3736_s15 + $0x254] sm:$0xf0]  ;;  %v3137_v4 = vld [vmem:[%s3736_s15 + $0x234] sm:$0xf] }
  0x4d   : > { %v2701_v5 = vor.u32 %v3142_v3, %v2700_v2  ;;  %v2702_v6 = vld [vmem:[%s3736_s15 + $0x258] sm:$0xf0]  ;;  %v2660_v7 = vld [vmem:[%s3736_s15 + $0x1e0] sm:$0xf]  ;;  %v3132_v8 = vld [vmem:[%s3736_s15 + $0x204] sm:$0xf0] }
  0x4e   : > { %v2705_v9 = vor.u32 %v3137_v4, %v2702_v6  ;;  %v3127_v10 = vld [vmem:[%s3736_s15 + $0x1e4] sm:$0xf]  ;;  %v2662_v11 = vld [vmem:[%s3736_s15 + $0x208] sm:$0xf0]  ;;  %v2708_v12 = vld [vmem:[%s3736_s15 + $0x238] sm:$0xf]  ;;  %v2661_v13 = vor.u32 %v3132_v8, %v2660_v7 }
  0x4f   : > { %881 = vmatpush.bf16.msra.mxu0 %v2701_v5  ;;  %v3143_v14 = vld [vmem:[%s3736_s15 + $0x25c] sm:$0xf0]  ;;  %v3138_v15 = vld [vmem:[%s3736_s15 + $0x23c] sm:$0xf]  ;;  %v2710_v16 = vld [vmem:[%s3736_s15 + $0x260] sm:$0xf0]  ;;  %v2665_v17 = vor.u32 %v3127_v10, %v2662_v11 }
  0x50   : > { %895 = vmatpush.bf16.msra.mxu1 %v2705_v9  ;;  %v2709_v18 = vor.u32 %v3143_v14, %v2708_v12  ;;  %v2713_v19 = vor.u32 %v3138_v15, %v2710_v16  ;;  %v2620_v20 = vld [vmem:[%s3736_s15 + $0x190] sm:$0xf]  ;;  %v3122_v21 = vld [vmem:[%s3736_s15 + $0x1b4] sm:$0xf0]  ;;  %v3117_v22 = vld [vmem:[%s3736_s15 + $0x194] sm:$0xf] }
  0x51   : > { %v2622_v23 = vld [vmem:[%s3736_s15 + $0x1b8] sm:$0xf0]  ;;  %v2668_v24 = vld [vmem:[%s3736_s15 + $0x1e8] sm:$0xf]  ;;  %v3133_v25 = vld [vmem:[%s3736_s15 + $0x20c] sm:$0xf0]  ;;  %v2621_v29 = vor.u32 %v3122_v21, %v2620_v20 }
  0x52   : > { %909 = vmatpush.bf16.msra.mxu2 %v2709_v18  ;;  %923 = vmatpush.bf16.msra.mxu3 %v2713_v19  ;;  %v2669_v26 = vor.u32 %v3133_v25, %v2668_v24  ;;  %v3128_v27 = vld [vmem:[%s3736_s15 + $0x1ec] sm:$0xf]  ;;  %v2670_v28 = vld [vmem:[%s3736_s15 + $0x210] sm:$0xf0]  ;;  %v2580_v31 = vld [vmem:[%s3736_s15 + $0x140] sm:$0xf]  ;;  %v2625_v33 = vor.u32 %v3117_v22, %v2622_v23 }
  0x53   : > { %882 = vmatpush.bf16.msra.mxu0 %v2661_v13  ;;  %v2673_v30 = vor.u32 %v3128_v27, %v2670_v28  ;;  %v3112_v32 = vld [vmem:[%s3736_s15 + $0x164] sm:$0xf0]  ;;  %v2628_v34 = vld [vmem:[%s3736_s15 + $0x198] sm:$0xf]  ;;  %v3123_v35 = vld [vmem:[%s3736_s15 + $0x1bc] sm:$0xf0] }
  0x54   : > { %896 = vmatpush.bf16.msra.mxu1 %v2665_v17  ;;  %v3118_v36 = vld [vmem:[%s3736_s15 + $0x19c] sm:$0xf]  ;;  %v3107_v37 = vld [vmem:[%s3736_s15 + $0x144] sm:$0xf]  ;;  %v2582_v38 = vld [vmem:[%s3736_s15 + $0x168] sm:$0xf0]  ;;  %v2629_v40 = vor.u32 %v3123_v35, %v2628_v34  ;;  %v2581_v43 = vor.u32 %v3112_v32, %v2580_v31 }
  0x55   : > { %v2630_v39 = vld [vmem:[%s3736_s15 + $0x1c0] sm:$0xf0]  ;;  %v2588_v42 = vld [vmem:[%s3736_s15 + $0x148] sm:$0xf]  ;;  %v3113_v44 = vld [vmem:[%s3736_s15 + $0x16c] sm:$0xf0]  ;;  %v2585_v47 = vor.u32 %v3107_v37, %v2582_v38 }
  0x56   : > { %910 = vmatpush.bf16.msra.mxu2 %v2669_v26  ;;  %924 = vmatpush.bf16.msra.mxu3 %v2673_v30  ;;  %v2633_v41 = vor.u32 %v3118_v36, %v2630_v39  ;;  %v3108_v45 = vld [vmem:[%s3736_s15 + $0x14c] sm:$0xf]  ;;  %v2590_v46 = vld [vmem:[%s3736_s15 + $0x170] sm:$0xf0]  ;;  %v2540_v48 = vld [vmem:[%s3736_s15 + $0xf0] sm:$0xf]  ;;  %v2589_v52 = vor.u32 %v3113_v44, %v2588_v42 }
  0x57   : > { %883 = vmatpush.bf16.msra.mxu0 %v2621_v29  ;;  %v3102_v49 = vld [vmem:[%s3736_s15 + $0x114] sm:$0xf0]  ;;  %v3097_v50 = vld [vmem:[%s3736_s15 + $0xf4] sm:$0xf]  ;;  %v2542_v51 = vld [vmem:[%s3736_s15 + $0x118] sm:$0xf0]  ;;  %v2593_v53 = vor.u32 %v3108_v45, %v2590_v46 }
  0x58   : > { %897 = vmatpush.bf16.msra.mxu1 %v2625_v33  ;;  %v2548_v54 = vld [vmem:[%s3736_s15 + $0xf8] sm:$0xf]  ;;  %v2541_v55 = vor.u32 %v3102_v49, %v2540_v48  ;;  %v3103_v56 = vld [vmem:[%s3736_s15 + $0x11c] sm:$0xf0]  ;;  %v3098_v57 = vld [vmem:[%s3736_s15 + $0xfc] sm:$0xf]  ;;  %v2545_v59 = vor.u32 %v3097_v50, %v2542_v51 }
  0x59   : > { %v2550_v58 = vld [vmem:[%s3736_s15 + $0x120] sm:$0xf0]  ;;  %v2500_v60 = vld [vmem:[%s3736_s15 + $0xa0] sm:$0xf]  ;;  %v3092_v61 = vld [vmem:[%s3736_s15 + $0xc4] sm:$0xf0]  ;;  %v2549_v0 = vor.u32 %v3103_v56, %v2548_v54 }
  0x5a   : > { %911 = vmatpush.bf16.msra.mxu2 %v2629_v40  ;;  %925 = vmatpush.bf16.msra.mxu3 %v2633_v41  ;;  %v3087_v62 = vld [vmem:[%s3736_s15 + $0xa4] sm:$0xf]  ;;  %v2502_v63 = vld [vmem:[%s3736_s15 + $0xc8] sm:$0xf0]  ;;  %v2553_v1 = vor.u32 %v3098_v57, %v2550_v58  ;;  %v2508_v2 = vld [vmem:[%s3736_s15 + $0xa8] sm:$0xf]  ;;  %v2501_v3 = vor.u32 %v3092_v61, %v2500_v60 }
  0x5b   : > { %884 = vmatpush.bf16.msra.mxu0 %v2581_v43  ;;  %v3093_v4 = vld [vmem:[%s3736_s15 + $0xcc] sm:$0xf0]  ;;  %v3088_v5 = vld [vmem:[%s3736_s15 + $0xac] sm:$0xf]  ;;  %v2510_v6 = vld [vmem:[%s3736_s15 + $0xd0] sm:$0xf0]  ;;  %v2505_v7 = vor.u32 %v3087_v62, %v2502_v63 }
  0x5c   : > { %898 = vmatpush.bf16.msra.mxu1 %v2585_v47  ;;  %v2460_v8 = vld [vmem:[%s3736_s15 + $0x50] sm:$0xf]  ;;  %v3082_v9 = vld [vmem:[%s3736_s15 + $0x74] sm:$0xf0]  ;;  %v3077_v10 = vld [vmem:[%s3736_s15 + $0x54] sm:$0xf]  ;;  %v2509_v12 = vor.u32 %v3093_v4, %v2508_v2  ;;  %v2513_v13 = vor.u32 %v3088_v5, %v2510_v6 }
  0x5d   : > { %v2462_v11 = vld [vmem:[%s3736_s15 + $0x78] sm:$0xf0]  ;;  %v2420_v14 = vld [vmem:[%s3736_s15] sm:$0xf]  ;;  %v2468_v15 = vld [vmem:[%s3736_s15 + $0x58] sm:$0xf]  ;;  %v2461_v16 = vor.u32 %v3082_v9, %v2460_v8 }
  0x5e   : > { %912 = vmatpush.bf16.msra.mxu2 %v2589_v52  ;;  %926 = vmatpush.bf16.msra.mxu3 %v2593_v53  ;;  %v3083_v17 = vld [vmem:[%s3736_s15 + $0x7c] sm:$0xf0]  ;;  %v3078_v18 = vld [vmem:[%s3736_s15 + $0x5c] sm:$0xf]  ;;  %v2470_v19 = vld [vmem:[%s3736_s15 + $0x80] sm:$0xf0]  ;;  %v2465_v20 = vor.u32 %v3077_v10, %v2462_v11 }
  0x5f   : > { %885 = vmatpush.bf16.msra.mxu0 %v2541_v55  ;;  %v3072_v21 = vld [vmem:[%s3736_s15 + $0x24] sm:$0xf0]  ;;  %v3067_v22 = vld [vmem:[%s3736_s15 + $0x4] sm:$0xf]  ;;  %v2422_v23 = vld [vmem:[%s3736_s15 + $0x28] sm:$0xf0]  ;;  %v2469_v27 = vor.u32 %v3083_v17, %v2468_v15  ;;  %v2473_v29 = vor.u32 %v3078_v18, %v2470_v19 }
  0x60   : > { %899 = vmatpush.bf16.msra.mxu1 %v2545_v59  ;;  %v2716_v24 = vld [vmem:[%s3736_s15 + $0x240] sm:$0xf]  ;;  %v3144_v25 = vld [vmem:[%s3736_s15 + $0x264] sm:$0xf0]  ;;  %v3139_v26 = vld [vmem:[%s3736_s15 + $0x244] sm:$0xf]  ;;  %v2421_v32 = vor.u32 %v3072_v21, %v2420_v14  ;;  %v2425_v36 = vor.u32 %v3067_v22, %v2422_v23 }
  0x61   : > { %v2718_v28 = vld [vmem:[%s3736_s15 + $0x268] sm:$0xf0]  ;;  %v2428_v30 = vld [vmem:[%s3736_s15 + $0x8] sm:$0xf]  ;;  %v3073_v31 = vld [vmem:[%s3736_s15 + $0x2c] sm:$0xf0]  ;;  %v2717_v37 = vor.u32 %v3144_v25, %v2716_v24 }
  0x62   : > { %913 = vmatpush.bf16.msra.mxu2 %v2549_v0  ;;  %927 = vmatpush.bf16.msra.mxu3 %v2553_v1  ;;  %v2724_v33 = vld [vmem:[%s3736_s15 + $0x248] sm:$0xf]  ;;  %v3068_v34 = vld [vmem:[%s3736_s15 + $0xc] sm:$0xf]  ;;  %v2430_v35 = vld [vmem:[%s3736_s15 + $0x30] sm:$0xf0]  ;;  %v2721_v41 = vor.u32 %v3139_v26, %v2718_v28  ;;  %v2429_v45 = vor.u32 %v3073_v31, %v2428_v30 }
  0x63   : > { %886 = vmatpush.bf16.msra.mxu0 %v2501_v3  ;;  %v3145_v38 = vld [vmem:[%s3736_s15 + $0x26c] sm:$0xf0]  ;;  %v3140_v39 = vld [vmem:[%s3736_s15 + $0x24c] sm:$0xf]  ;;  %v2726_v40 = vld [vmem:[%s3736_s15 + $0x270] sm:$0xf0]  ;;  %v2433_v47 = vor.u32 %v3068_v34, %v2430_v35 }
  0x64   : > { %900 = vmatpush.bf16.msra.mxu1 %v2505_v7  ;;  %v2676_v42 = vld [vmem:[%s3736_s15 + $0x1f0] sm:$0xf]  ;;  %v3134_v43 = vld [vmem:[%s3736_s15 + $0x214] sm:$0xf0]  ;;  %v3129_v44 = vld [vmem:[%s3736_s15 + $0x1f4] sm:$0xf]  ;;  %v2725_v50 = vor.u32 %v3145_v38, %v2724_v33  ;;  %v2729_v51 = vor.u32 %v3140_v39, %v2726_v40 }
  0x65   : > { %v2678_v46 = vld [vmem:[%s3736_s15 + $0x218] sm:$0xf0]  ;;  %v374_v48 = vld [vmem:[#allocation2] sm:$0xff]  ;;  %v375_v49 = vld [vmem:[#allocation2 + $0x8] sm:$0xff]  ;;  %v2677_v53 = vor.u32 %v3134_v43, %v2676_v42  ;;  %p3058_p7 = scmp.ne.s32.totalorder %s3655_s7, 2 }
  0x66   : > { %914 = vmatpush.bf16.msra.mxu2 %v2509_v12  ;;  %928 = vmatpush.bf16.msra.mxu3 %v2513_v13  ;;  %v2684_v52 = vld [vmem:[%s3736_s15 + $0x1f8] sm:$0xf]  ;;  %v3135_v54 = vld [vmem:[%s3736_s15 + $0x21c] sm:$0xf0]  ;;  %v3130_v55 = vld [vmem:[%s3736_s15 + $0x1fc] sm:$0xf]  ;;  %v2681_v57 = vor.u32 %v3129_v44, %v2678_v46  ;;  %v3857_v60 = vpack.c.bf16 %v375_v49, %v374_v48 }
  0x67   : > { %887 = vmatpush.bf16.msra.mxu0 %v2461_v16  ;;  %v2686_v56 = vld [vmem:[%s3736_s15 + $0x220] sm:$0xf0]  ;;  %v2636_v58 = vld [vmem:[%s3736_s15 + $0x1a0] sm:$0xf]  ;;  %v3124_v59 = vld [vmem:[%s3736_s15 + $0x1c4] sm:$0xf0]  ;;  %v2685_v63 = vor.u32 %v3135_v54, %v2684_v52 }
  0x68   : > { %901 = vmatpush.bf16.msra.mxu1 %v2465_v20  ;;  %v3119_v61 = vld [vmem:[%s3736_s15 + $0x1a4] sm:$0xf]  ;;  %v2638_v62 = vld [vmem:[%s3736_s15 + $0x1c8] sm:$0xf0]  ;;  %v2689_v0 = vor.u32 %v3130_v55, %v2686_v56  ;;  %v2644_v1 = vld [vmem:[%s3736_s15 + $0x1a8] sm:$0xf]  ;;  %v2637_v2 = vor.u32 %v3124_v59, %v2636_v58 }
  0x69   : > { %v3125_v3 = vld [vmem:[%s3736_s15 + $0x1cc] sm:$0xf0]  ;;  %v3120_v4 = vld [vmem:[%s3736_s15 + $0x1ac] sm:$0xf]  ;;  %v2646_v5 = vld [vmem:[%s3736_s15 + $0x1d0] sm:$0xf0]  ;;  %v2641_v6 = vor.u32 %v3119_v61, %v2638_v62 }
  0x6a   : > { %915 = vmatpush.bf16.msra.mxu2 %v2469_v27  ;;  %929 = vmatpush.bf16.msra.mxu3 %v2473_v29  ;;  %v2596_v7 = vld [vmem:[%s3736_s15 + $0x150] sm:$0xf]  ;;  %v3114_v8 = vld [vmem:[%s3736_s15 + $0x174] sm:$0xf0]  ;;  %v3109_v9 = vld [vmem:[%s3736_s15 + $0x154] sm:$0xf]  ;;  %v2645_v11 = vor.u32 %v3125_v3, %v2644_v1  ;;  %v2649_v12 = vor.u32 %v3120_v4, %v2646_v5 }
  0x6b   : > { %888 = vmatpush.bf16.msra.mxu0 %v2421_v32  ;;  %v2598_v10 = vld [vmem:[%s3736_s15 + $0x178] sm:$0xf0]  ;;  %v2604_v13 = vld [vmem:[%s3736_s15 + $0x158] sm:$0xf]  ;;  %v2597_v14 = vor.u32 %v3114_v8, %v2596_v7  ;;  %v3115_v15 = vld [vmem:[%s3736_s15 + $0x17c] sm:$0xf0] }
  0x6c   : > { %902 = vmatpush.bf16.msra.mxu1 %v2425_v36  ;;  %v3110_v16 = vld [vmem:[%s3736_s15 + $0x15c] sm:$0xf]  ;;  %v2606_v17 = vld [vmem:[%s3736_s15 + $0x180] sm:$0xf0]  ;;  %v2601_v18 = vor.u32 %v3109_v9, %v2598_v10  ;;  %v2556_v19 = vld [vmem:[%s3736_s15 + $0x100] sm:$0xf]  ;;  %v2605_v23 = vor.u32 %v3115_v15, %v2604_v13 }
  0x6d   : > { %v3104_v20 = vld [vmem:[%s3736_s15 + $0x124] sm:$0xf0]  ;;  %v3099_v21 = vld [vmem:[%s3736_s15 + $0x104] sm:$0xf]  ;;  %v2558_v22 = vld [vmem:[%s3736_s15 + $0x128] sm:$0xf0]  ;;  %v2609_v24 = vor.u32 %v3110_v16, %v2606_v17 }
  0x6e   : > { %916 = vmatpush.bf16.msra.mxu2 %v2429_v45  ;;  %930 = vmatpush.bf16.msra.mxu3 %v2433_v47  ;;  %v2564_v25 = vld [vmem:[%s3736_s15 + $0x108] sm:$0xf]  ;;  %v2557_v26 = vor.u32 %v3104_v20, %v2556_v19  ;;  %v3105_v27 = vld [vmem:[%s3736_s15 + $0x12c] sm:$0xf0]  ;;  %v3100_v28 = vld [vmem:[%s3736_s15 + $0x10c] sm:$0xf]  ;;  %v2561_v30 = vor.u32 %v3099_v21, %v2558_v22 }
  0x6f   : > { %937 = vmatpush.bf16.msrb.mxu0 %v2717_v37  ;;  %903 = vmatmul.bf16.vlgmr.msra.gmra.mxu1 %v3857_v60  ;;  %v2566_v29 = vld [vmem:[%s3736_s15 + $0x130] sm:$0xf0]  ;;  %v2516_v31 = vld [vmem:[%s3736_s15 + $0xb0] sm:$0xf]  ;;  %v3094_v32 = vld [vmem:[%s3736_s15 + $0xd4] sm:$0xf0]  ;;  %v2565_v35 = vor.u32 %v3105_v27, %v2564_v25 }
  0x70   : > { %951 = vmatpush.bf16.msrb.mxu1 %v2721_v41  ;;  %889 = vmatmul.bf16.vlgmr.msra.gmra.mxu0 %v3857_v60  ;;  %v3089_v33 = vld [vmem:[%s3736_s15 + $0xb4] sm:$0xf]  ;;  %v2518_v34 = vld [vmem:[%s3736_s15 + $0xd8] sm:$0xf0]  ;;  %v2569_v36 = vor.u32 %v3100_v28, %v2566_v29  ;;  %v2524_v37 = vld [vmem:[%s3736_s15 + $0xb8] sm:$0xf]  ;;  %v2517_v38 = vor.u32 %v3094_v32, %v2516_v31 }
  0x71   : > { %917 = vmatmul.bf16.vlgmr.msra.gmra.mxu2 %v3857_v60  ;;  %931 = vmatmul.bf16.vlgmr.msra.gmra.mxu3 %v3857_v60  ;;  %v3095_v39 = vld [vmem:[%s3736_s15 + $0xdc] sm:$0xf0]  ;;  %v3090_v40 = vld [vmem:[%s3736_s15 + $0xbc] sm:$0xf]  ;;  %v2526_v41 = vld [vmem:[%s3736_s15 + $0xe0] sm:$0xf0]  ;;  %v2521_v42 = vor.u32 %v3089_v33, %v2518_v34 }
  0x72   : > { %965 = vmatpush.bf16.msrb.mxu2 %v2725_v50  ;;  %979 = vmatpush.bf16.msrb.mxu3 %v2729_v51  ;;  %v2476_v43 = vld [vmem:[%s3736_s15 + $0x60] sm:$0xf]  ;;  %v3084_v44 = vld [vmem:[%s3736_s15 + $0x84] sm:$0xf0]  ;;  %v3079_v45 = vld [vmem:[%s3736_s15 + $0x64] sm:$0xf]  ;;  %v2525_v47 = vor.u32 %v3095_v39, %v2524_v37  ;;  %v2529_v48 = vor.u32 %v3090_v40, %v2526_v41 }
  0x73   : > { %938 = vmatpush.bf16.msrb.mxu0 %v2677_v53  ;;  %v2478_v46 = vld [vmem:[%s3736_s15 + $0x88] sm:$0xf0]  ;;  %v2484_v49 = vld [vmem:[%s3736_s15 + $0x68] sm:$0xf]  ;;  %v3085_v50 = vld [vmem:[%s3736_s15 + $0x8c] sm:$0xf0]  ;;  %v2477_v51 = vor.u32 %v3084_v44, %v2476_v43 }
  0x74   : > { %952 = vmatpush.bf16.msrb.mxu1 %v2681_v57  ;;  %v3080_v52 = vld [vmem:[%s3736_s15 + $0x6c] sm:$0xf]  ;;  %v2486_v53 = vld [vmem:[%s3736_s15 + $0x90] sm:$0xf0]  ;;  %v2481_v54 = vor.u32 %v3079_v45, %v2478_v46  ;;  %v2436_v55 = vld [vmem:[%s3736_s15 + $0x10] sm:$0xf]  ;;  %v2485_v62 = vor.u32 %v3085_v50, %v2484_v49 }
  0x75   : > { %v3074_v56 = vld [vmem:[%s3736_s15 + $0x34] sm:$0xf0]  ;;  %v3069_v57 = vld [vmem:[%s3736_s15 + $0x14] sm:$0xf]  ;;  %v2438_v58 = vld [vmem:[%s3736_s15 + $0x38] sm:$0xf0]  ;;  %v2489_v1 = vor.u32 %v3080_v52, %v2486_v53 }
  0x76   : > { %966 = vmatpush.bf16.msrb.mxu2 %v2685_v63  ;;  %980 = vmatpush.bf16.msrb.mxu3 %v2689_v0  ;;  %v2732_v59 = vld [vmem:[%s3736_s15 + $0x250] sm:$0xf]  ;;  %v3146_v61 = vld [vmem:[%s3736_s15 + $0x274] sm:$0xf0]  ;;  %v3141_v63 = vld [vmem:[%s3736_s15 + $0x254] sm:$0xf]  ;;  %v2441_v5 = vor.u32 %v3069_v57, %v2438_v58 }
  0x77   : > { %939 = vmatpush.bf16.msrb.mxu0 %v2637_v2  ;;  %v2734_v0 = vld [vmem:[%s3736_s15 + $0x278] sm:$0xf0]  ;;  %v2437_v2 = vor.u32 %v3074_v56, %v2436_v55  ;;  %v2444_v3 = vld [vmem:[%s3736_s15 + $0x18] sm:$0xf]  ;;  %v3075_v4 = vld [vmem:[%s3736_s15 + $0x3c] sm:$0xf0] }
  0x78   : > { %953 = vmatpush.bf16.msrb.mxu1 %v2641_v6  ;;  %v2733_v6 = vor.u32 %v3146_v61, %v2732_v59  ;;  %v3070_v7 = vld [vmem:[%s3736_s15 + $0x1c] sm:$0xf]  ;;  %v2446_v8 = vld [vmem:[%s3736_s15 + $0x40] sm:$0xf0]  ;;  %v2737_v9 = vor.u32 %v3141_v63, %v2734_v0  ;;  %v2692_v10 = vld [vmem:[%s3736_s15 + $0x200] sm:$0xf] }
  0x79   : > { %v3131_v13 = vld [vmem:[%s3736_s15 + $0x204] sm:$0xf]  ;;  %v2449_v15 = vor.u32 %v3070_v7, %v2446_v8  ;;  %v3154_v17 = vld [vmem:[%s3742_s30 + $0x38] sm:$0xff]  ;;  %v2652_v19 = vld [vmem:[%s3736_s15 + $0x1b0] sm:$0xf] }
  0x7a   : > { %967 = vmatpush.bf16.msrb.mxu2 %v2645_v11  ;;  %981 = vmatpush.bf16.msrb.mxu3 %v2649_v12  ;;  %v3136_v11 = vld [vmem:[%s3736_s15 + $0x224] sm:$0xf0]  ;;  %v2445_v12 = vor.u32 %v3075_v4, %v2444_v3  ;;  %v3126_v20 = vld [vmem:[%s3736_s15 + $0x1d4] sm:$0xf0]  ;;  %v3121_v21 = vld [vmem:[%s3736_s15 + $0x1b4] sm:$0xf] }
  0x7b   : > { %940 = vmatpush.bf16.msrb.mxu0 %v2597_v14  ;;  %v2694_v14 = vld [vmem:[%s3736_s15 + $0x228] sm:$0xf0]  ;;  %v2693_v16 = vor.u32 %v3136_v11, %v2692_v10  ;;  %v2654_v22 = vld [vmem:[%s3736_s15 + $0x1d8] sm:$0xf0]  ;;  %v3153_v25 = vld [vmem:[%s3742_s30 + $0x30] sm:$0xff] }
  0x7c   : > { %954 = vmatpush.bf16.msrb.mxu1 %v2601_v18  ;;  %v2697_v18 = vor.u32 %v3131_v13, %v2694_v14  ;;  %v2612_v27 = vld [vmem:[%s3736_s15 + $0x160] sm:$0xf]  ;;  %v3116_v28 = vld [vmem:[%s3736_s15 + $0x184] sm:$0xf0]  ;;  %v3111_v29 = vld [vmem:[%s3736_s15 + $0x164] sm:$0xf] }
  0x7d   : > { %v3161_v31 = vld [vmem:[%s3742_s30 + $0x70] sm:$0xff]  ;;  %v2613_v32 = vor.u32 %v3116_v28, %v2612_v27  ;;  %v3152_v33 = vld [vmem:[%s3742_s30 + $0x28] sm:$0xff]  ;;  %v3151_v41 = vld [vmem:[%s3742_s30 + $0x20] sm:$0xff] }
  0x7e   : > { %968 = vmatpush.bf16.msrb.mxu2 %v2605_v23  ;;  %982 = vmatpush.bf16.msrb.mxu3 %v2609_v24  ;;  %v3162_v23 = vld [vmem:[%s3742_s30 + $0x78] sm:$0xff]  ;;  %v2653_v24 = vor.u32 %v3126_v20, %v2652_v19  ;;  %v3101_v37 = vld [vmem:[%s3736_s15 + $0x114] sm:$0xf]  ;;  %v3160_v39 = vld [vmem:[%s3742_s30 + $0x68] sm:$0xff] }
  0x7f   : > { %941 = vmatpush.bf16.msrb.mxu0 %v2557_v26  ;;  %v2657_v26 = vor.u32 %v3121_v21, %v2654_v22  ;;  %v2532_v43 = vld [vmem:[%s3736_s15 + $0xc0] sm:$0xf]  ;;  %v3096_v44 = vld [vmem:[%s3736_s15 + $0xe4] sm:$0xf0]  ;;  %v3091_v45 = vld [vmem:[%s3736_s15 + $0xc4] sm:$0xf] }
  0x80   : > { %955 = vmatpush.bf16.msrb.mxu1 %v2561_v30  ;;  %v2614_v30 = vld [vmem:[%s3736_s15 + $0x188] sm:$0xf0]  ;;  %v3150_v49 = vld [vmem:[%s3742_s30 + $0x18] sm:$0xff]  ;;  %v3081_v53 = vld [vmem:[%s3736_s15 + $0x74] sm:$0xf] }
  0x81   : > { %v2617_v34 = vor.u32 %v3111_v29, %v2614_v30  ;;  %v2534_v46 = vld [vmem:[%s3736_s15 + $0xe8] sm:$0xf0]  ;;  %v3086_v52 = vld [vmem:[%s3736_s15 + $0x94] sm:$0xf0]  ;;  %v3149_v57 = vld [vmem:[%s3742_s30 + $0x10] sm:$0xff] }
  0x82   : > { %969 = vmatpush.bf16.msrb.mxu2 %v2565_v35  ;;  %983 = vmatpush.bf16.msrb.mxu3 %v2569_v36  ;;  %v2572_v35 = vld [vmem:[%s3736_s15 + $0x110] sm:$0xf]  ;;  %v3106_v36 = vld [vmem:[%s3736_s15 + $0x134] sm:$0xf0]  ;;  %v2537_v50 = vor.u32 %v3091_v45, %v2534_v46  ;;  %v2452_v59 = vld [vmem:[%s3736_s15 + $0x20] sm:$0xf] }
  0x83   : > { %942 = vmatpush.bf16.msrb.mxu0 %v2517_v38  ;;  %v2574_v38 = vld [vmem:[%s3736_s15 + $0x138] sm:$0xf0]  ;;  %v2573_v40 = vor.u32 %v3106_v36, %v2572_v35  ;;  %v3076_v61 = vld [vmem:[%s3736_s15 + $0x44] sm:$0xf0]  ;;  %v2454_v63 = vld [vmem:[%s3736_s15 + $0x48] sm:$0xf0] }
  0x84   : > { %956 = vmatpush.bf16.msrb.mxu1 %v2521_v42  ;;  %v2577_v42 = vor.u32 %v3101_v37, %v2574_v38  ;;  %v3158_v55 = vld [vmem:[%s3742_s30 + $0x58] sm:$0xff]  ;;  %v3157_v0 = vld [vmem:[%s3742_s30 + $0x50] sm:$0xff]  ;;  %v3176_v10 = vld [vmem:[%s3742_s30 + $0xe8] sm:$0xff] }
  0x85   : > { %v3170_v4 = vld [vmem:[%s3742_s30 + $0xb8] sm:$0xff]  ;;  %v3169_v7 = vld [vmem:[%s3742_s30 + $0xb0] sm:$0xff]  ;;  %v3167_v11 = vld [vmem:[%s3742_s30 + $0xa0] sm:$0xff] }
  0x86   : > { %970 = vmatpush.bf16.msrb.mxu2 %v2525_v47  ;;  %984 = vmatpush.bf16.msrb.mxu3 %v2529_v48  ;;  %v3159_v47 = vld [vmem:[%s3742_s30 + $0x60] sm:$0xff]  ;;  %v2533_v48 = vor.u32 %v3096_v44, %v2532_v43  ;;  %v3177_v8 = vld [vmem:[%s3742_s30 + $0xf0] sm:$0xff]  ;;  %v3166_v13 = vld [vmem:[%s3742_s30 + $0x98] sm:$0xff] }
  0x87   : > { %943 = vmatpush.bf16.msrb.mxu0 %v2477_v51  ;;  %v2492_v51 = vld [vmem:[%s3736_s15 + $0x70] sm:$0xf]  ;;  %v3147_v14 = vld [vmem:[%s3742_s30] sm:$0xff]  ;;  %v3164_v22 = vld [vmem:[%s3742_s30 + $0x88] sm:$0xff] }
  0x88   : > { %957 = vmatpush.bf16.msrb.mxu1 %v2481_v54  ;;  %v2494_v54 = vld [vmem:[%s3736_s15 + $0x98] sm:$0xf0]  ;;  %v2493_v56 = vor.u32 %v3086_v52, %v2492_v51  ;;  %v3173_v19 = vld [vmem:[%s3742_s30 + $0xd0] sm:$0xff]  ;;  %v3171_v27 = vld [vmem:[%s3742_s30 + $0xc0] sm:$0xff] }
  0x89   : > { %v2497_v58 = vor.u32 %v3081_v53, %v2494_v54  ;;  %v3185_v20 = vld [vmem:[%s3742_s30 + $0x130] sm:$0xff]  ;;  %v3202_v28 = vld [vmem:[%s3742_s30 + $0x1b8] sm:$0xff]  ;;  %v3183_v29 = vld [vmem:[%s3742_s30 + $0x120] sm:$0xff] }
  0x8a   : > { %971 = vmatpush.bf16.msrb.mxu2 %v2485_v62  ;;  %985 = vmatpush.bf16.msrb.mxu3 %v2489_v1  ;;  %v3071_v62 = vld [vmem:[%s3736_s15 + $0x24] sm:$0xf]  ;;  %v2453_v1 = vor.u32 %v3076_v61, %v2452_v59  ;;  %v3193_v21 = vld [vmem:[%s3742_s30 + $0x170] sm:$0xff]  ;;  %v3200_v36 = vld [vmem:[%s3742_s30 + $0x1a8] sm:$0xff] }
  0x8b   : > { %944 = vmatpush.bf16.msrb.mxu0 %v2437_v2  ;;  %v3148_v2 = vld [vmem:[%s3742_s30 + $0x8] sm:$0xff]  ;;  %v2457_v3 = vor.u32 %v3071_v62, %v2454_v63  ;;  %v3191_v30 = vld [vmem:[%s3742_s30 + $0x160] sm:$0xff]  ;;  %v3209_v35 = vld [vmem:[%s3742_s30 + $0x1f0] sm:$0xff] }
  0x8c   : > { %958 = vmatpush.bf16.msrb.mxu1 %v2441_v5  ;;  %v3178_v5 = vld [vmem:[%s3742_s30 + $0xf8] sm:$0xff]  ;;  %v3181_v37 = vld [vmem:[%s3742_s30 + $0x110] sm:$0xff]  ;;  %v3180_v46 = vld [vmem:[%s3742_s30 + $0x108] sm:$0xff] }
  0x8d   : > { %v3189_v38 = vld [vmem:[%s3742_s30 + $0x150] sm:$0xff]  ;;  %v3179_v52 = vld [vmem:[%s3742_s30 + $0x100] sm:$0xff]  ;;  %v3206_v54 = vld [vmem:[%s3742_s30 + $0x1d8] sm:$0xff] }
  0x8e   : > { %945 = vmatmul.bf16.vlgmr.msrb.gmra.mxu0 %v3857_v60  ;;  %972 = vmatpush.bf16.msrb.mxu2 %v2445_v12  ;;  %v3175_v12 = vld [vmem:[%s3742_s30 + $0xe0] sm:$0xff] }
  0x8f   : > { %993 = vmatpush.bf16.msra.mxu0 %v2733_v6  ;;  %959 = vmatmul.bf16.vlgmr.msrb.gmra.mxu1 %v3857_v60  ;;  %v3156_v6 = vld [vmem:[%s3742_s30 + $0x48] sm:$0xff]  ;;  %v3187_v53 = vld [vmem:[%s3742_s30 + $0x140] sm:$0xff] }
  0x90   : > { %1007 = vmatpush.bf16.msra.mxu1 %v2737_v9  ;;  %986 = vmatpush.bf16.msrb.mxu3 %v2449_v15  ;;  %v3168_v9 = vld [vmem:[%s3742_s30 + $0xa8] sm:$0xff]  ;;  %v3155_v15 = vld [vmem:[%s3742_s30 + $0x40] sm:$0xff] }
  0x91   : > { %973 = vmatmul.bf16.vlgmr.msrb.gmra.mxu2 %v3857_v60 }
  0x92   : > { %1695 = vmatpush.bf16.msra.mxu2 %v3154_v17  ;;  %v3194_v17 = vld [vmem:[%s3742_s30 + $0x178] sm:$0xff] }
  0x93   : > { %994 = vmatpush.bf16.msra.mxu0 %v2693_v16  ;;  %987 = vmatmul.bf16.vlgmr.msrb.gmra.mxu3 %v3857_v60  ;;  %v3174_v16 = vld [vmem:[%s3742_s30 + $0xd8] sm:$0xff] }
  0x94   : > { %1008 = vmatpush.bf16.msra.mxu1 %v2697_v18  ;;  %1709 = vmatpush.bf16.msra.mxu3 %v3162_v23  ;;  %v3165_v18 = vld [vmem:[%s3742_s30 + $0x90] sm:$0xff]  ;;  %v3172_v23 = vld [vmem:[%s3742_s30 + $0xc8] sm:$0xff] }
  0x96   : > { %1696 = vmatpush.bf16.msra.mxu2 %v3153_v25  ;;  %v3192_v25 = vld [vmem:[%s3742_s30 + $0x168] sm:$0xff] }
  0x97   : > { %995 = vmatpush.bf16.msra.mxu0 %v2653_v24  ;;  %v3184_v24 = vld [vmem:[%s3742_s30 + $0x128] sm:$0xff] }
  0x98   : > { %1009 = vmatpush.bf16.msra.mxu1 %v2657_v26  ;;  %1710 = vmatpush.bf16.msra.mxu3 %v3161_v31  ;;  %v3163_v26 = vld [vmem:[%s3742_s30 + $0x80] sm:$0xff]  ;;  %v3210_v31 = vld [vmem:[%s3742_s30 + $0x1f8] sm:$0xff] }
  0x9a   : > { %1697 = vmatpush.bf16.msra.mxu2 %v3152_v33  ;;  %v3182_v33 = vld [vmem:[%s3742_s30 + $0x118] sm:$0xff] }
  0x9b   : > { %996 = vmatpush.bf16.msra.mxu0 %v2613_v32  ;;  %v3201_v32 = vld [vmem:[%s3742_s30 + $0x1b0] sm:$0xff] }
  0x9c   : > { %1010 = vmatpush.bf16.msra.mxu1 %v2617_v34  ;;  %1711 = vmatpush.bf16.msra.mxu3 %v3160_v39  ;;  %v3190_v34 = vld [vmem:[%s3742_s30 + $0x158] sm:$0xff]  ;;  %v3208_v39 = vld [vmem:[%s3742_s30 + $0x1e8] sm:$0xff] }
  0x9e   : > { %1698 = vmatpush.bf16.msra.mxu2 %v3151_v41  ;;  %v3199_v41 = vld [vmem:[%s3742_s30 + $0x1a0] sm:$0xff] }
  0x9f   : > { %997 = vmatpush.bf16.msra.mxu0 %v2573_v40  ;;  %v3998_v40 = vld [vmem:[%s3760_s26] sm:$0xff] }
  0xa0   : > { %1011 = vmatpush.bf16.msra.mxu1 %v2577_v42  ;;  %1712 = vmatpush.bf16.msra.mxu3 %v3159_v47  ;;  %v462_v44 = vperm.slane %v3998_v40, 1  ;;  %v461_v45 = vperm.slane %v3998_v40, 0  ;;  %v3188_v47 = vld [vmem:[%s3742_s30 + $0x148] sm:$0xff]  ;;  %v463_v62 = vperm.slane %v3998_v40, 2 }
  0xa2   : > { %1699 = vmatpush.bf16.msra.mxu2 %v3150_v49  ;;  %v3198_v49 = vld [vmem:[%s3742_s30 + $0x198] sm:$0xff] }
  0xa3   : > { %998 = vmatpush.bf16.msra.mxu0 %v2533_v48  ;;  %v3207_v48 = vld [vmem:[%s3742_s30 + $0x1e0] sm:$0xff] }
  0xa4   : > { %1012 = vmatpush.bf16.msra.mxu1 %v2537_v50  ;;  %1713 = vmatpush.bf16.msra.mxu3 %v3158_v55 }
  0xa6   : > { %1700 = vmatpush.bf16.msra.mxu2 %v3149_v57  ;;  %v3197_v57 = vld [vmem:[%s3742_s30 + $0x190] sm:$0xff] }
  0xa7   : > { %999 = vmatpush.bf16.msra.mxu0 %v2493_v56 }
  0xa8   : > { %1013 = vmatpush.bf16.msra.mxu1 %v2497_v58  ;;  %1714 = vmatpush.bf16.msra.mxu3 %v3157_v0 }
  0xaa   : > { %1701 = vmatpush.bf16.msra.mxu2 %v3148_v2  ;;  %v464_v2 = vperm.slane %v3998_v40, 3 }
  0xab   : > { %1000 = vmatpush.bf16.msra.mxu0 %v2453_v1 }
  0xac   : > { %1014 = vmatpush.bf16.msra.mxu1 %v2457_v3  ;;  %1715 = vmatpush.bf16.msra.mxu3 %v3156_v6  ;;  %v3205_v3 = vld [vmem:[%s3742_s30 + $0x1d0] sm:$0xff]  ;;  %v3226_v6 = vld [vmem:[%s3742_s30 + $0x278] sm:$0xff] }
  0xae   : > { %1001 = vmatmul.bf16.vlgmr.msra.gmra.mxu0 %v3857_v60  ;;  %1702 = vmatpush.bf16.msra.mxu2 %v3147_v14 }
  0xaf   : > { %1723 = vmatpush.bf16.msrb.mxu0 %v3170_v4  ;;  %1015 = vmatmul.bf16.vlgmr.msra.gmra.mxu1 %v3857_v60  ;;  %v3186_v60 = vld [vmem:[%s3742_s30 + $0x138] sm:$0xff] }
  0xb0   : > { %1737 = vmatpush.bf16.msrb.mxu1 %v3178_v5  ;;  %1716 = vmatpush.bf16.msra.mxu3 %v3155_v15  ;;  %v3225_v15 = vld [vmem:[%s3742_s30 + $0x270] sm:$0xff] }
  0xb2   : > { %1751 = vmatpush.bf16.msrb.mxu2 %v3186_v60 }
  0xb3   : > { %1724 = vmatpush.bf16.msrb.mxu0 %v3169_v7  ;;  %v3196_v7 = vld [vmem:[%s3742_s30 + $0x188] sm:$0xff] }
  0xb4   : > { %1738 = vmatpush.bf16.msrb.mxu1 %v3177_v8  ;;  %1765 = vmatpush.bf16.msrb.mxu3 %v3194_v17 }
  0xb6   : > { %1752 = vmatpush.bf16.msrb.mxu2 %v3185_v20 }
  0xb7   : > { %1725 = vmatpush.bf16.msrb.mxu0 %v3168_v9 }
  0xb8   : > { %1739 = vmatpush.bf16.msrb.mxu1 %v3176_v10  ;;  %1766 = vmatpush.bf16.msrb.mxu3 %v3193_v21  ;;  %v3218_v10 = vld [vmem:[%s3742_s30 + $0x238] sm:$0xff] }
  0xba   : > { %1753 = vmatpush.bf16.msrb.mxu2 %v3184_v24 }
  0xbb   : > { %1726 = vmatpush.bf16.msrb.mxu0 %v3167_v11 }
  0xbc   : > { %1740 = vmatpush.bf16.msrb.mxu1 %v3175_v12  ;;  %1767 = vmatpush.bf16.msrb.mxu3 %v3192_v25  ;;  %v3224_v25 = vld [vmem:[%s3742_s30 + $0x268] sm:$0xff] }
  0xbe   : > { %1754 = vmatpush.bf16.msrb.mxu2 %v3183_v29  ;;  %v3223_v29 = vld [vmem:[%s3742_s30 + $0x260] sm:$0xff] }
  0xbf   : > { %1727 = vmatpush.bf16.msrb.mxu0 %v3166_v13  ;;  %v3204_v13 = vld [vmem:[%s3742_s30 + $0x1c8] sm:$0xff] }
  0xc0   : > { %1741 = vmatpush.bf16.msrb.mxu1 %v3174_v16  ;;  %1768 = vmatpush.bf16.msrb.mxu3 %v3191_v30  ;;  %v3195_v16 = vld [vmem:[%s3742_s30 + $0x180] sm:$0xff] }
  0xc1   : > { %v3215_v30 = vld [vmem:[%s3742_s30 + $0x220] sm:$0xff] }
  0xc2   : > { %1755 = vmatpush.bf16.msrb.mxu2 %v3182_v33 }
  0xc3   : > { %1728 = vmatpush.bf16.msrb.mxu0 %v3165_v18 }
  0xc4   : > { %1742 = vmatpush.bf16.msrb.mxu1 %v3173_v19  ;;  %1769 = vmatpush.bf16.msrb.mxu3 %v3190_v34  ;;  %v3217_v19 = vld [vmem:[%s3742_s30 + $0x230] sm:$0xff]  ;;  %v3222_v34 = vld [vmem:[%s3742_s30 + $0x258] sm:$0xff] }
  0xc6   : > { %1756 = vmatpush.bf16.msrb.mxu2 %v3181_v37 }
  0xc7   : > { %1729 = vmatpush.bf16.msrb.mxu0 %v3164_v22  ;;  %v3203_v22 = vld [vmem:[%s3742_s30 + $0x1c0] sm:$0xff] }
  0xc8   : > { %1743 = vmatpush.bf16.msrb.mxu1 %v3172_v23  ;;  %1770 = vmatpush.bf16.msrb.mxu3 %v3189_v38  ;;  %v3221_v38 = vld [vmem:[%s3742_s30 + $0x250] sm:$0xff] }
  0xca   : > { %1757 = vmatpush.bf16.msrb.mxu2 %v3180_v46 }
  0xcb   : > { %1730 = vmatpush.bf16.msrb.mxu0 %v3163_v26 }
  0xcc   : > { %1744 = vmatpush.bf16.msrb.mxu1 %v3171_v27  ;;  %1771 = vmatpush.bf16.msrb.mxu3 %v3188_v47  ;;  %v3216_v27 = vld [vmem:[%s3742_s30 + $0x228] sm:$0xff] }
  0xcd   : > { %v3220_v47 = vld [vmem:[%s3742_s30 + $0x248] sm:$0xff] }
  0xce   : > { %1758 = vmatpush.bf16.msrb.mxu2 %v3179_v52  ;;  %v3212_v52 = vld [vmem:[%s3742_s30 + $0x208] sm:$0xff] }
  0xcf   : > { %1779 = vmatpush.bf16.msra.mxu0 %v3202_v28 }
  0xd0   : > { %1793 = vmatpush.bf16.msra.mxu1 %v3210_v31  ;;  %1772 = vmatpush.bf16.msrb.mxu3 %v3187_v53 }
  0xd3   : > { %1780 = vmatpush.bf16.msra.mxu0 %v3201_v32  ;;  %v465_v32 = vperm.slane %v3998_v40, 4 }
  0xd4   : > { %1794 = vmatpush.bf16.msra.mxu1 %v3209_v35  ;;  %v466_v35 = vperm.slane %v3998_v40, 5 }
  0xd7   : > { %1781 = vmatpush.bf16.msra.mxu0 %v3200_v36  ;;  %v3214_v36 = vld [vmem:[%s3742_s30 + $0x218] sm:$0xff] }
  0xd8   : > { %1795 = vmatpush.bf16.msra.mxu1 %v3208_v39 }
  0xdb   : > { %1782 = vmatpush.bf16.msra.mxu0 %v3199_v41  ;;  %v3213_v41 = vld [vmem:[%s3742_s30 + $0x210] sm:$0xff] }
  0xdc   : > { %1796 = vmatpush.bf16.msra.mxu1 %v3207_v48 }
  0xdf   : > { %1783 = vmatpush.bf16.msra.mxu0 %v3198_v49 }
  0xe0   : > { %1797 = vmatpush.bf16.msra.mxu1 %v3206_v54  ;;  %v468_v54 = vperm.slane %v3998_v40, 7 }
  0xe3   : > { %1784 = vmatpush.bf16.msra.mxu0 %v3197_v57  ;;  %v3219_v57 = vld [vmem:[%s3742_s30 + $0x240] sm:$0xff] }
  0xe4   : > { %1798 = vmatpush.bf16.msra.mxu1 %v3205_v3 }
  0xe7   : > { %1785 = vmatpush.bf16.msra.mxu0 %v3196_v7 }
  0xe8   : > { %1799 = vmatpush.bf16.msra.mxu1 %v3204_v13 }
  0xeb   : > { %1786 = vmatpush.bf16.msra.mxu0 %v3195_v16 }
  0xec   : > { %v904_v42 = vpop.f32.mrf.mxu1  ;;  %1800 = vmatpush.bf16.msra.mxu1 %v3203_v22 }
  0xed   : > { %v890_v43 = vpop.f32.mrf.mxu0  ;;  %v905_v50 = vadd.f32 %v904_v42, %v462_v44 }
  0xee   : > { %v891_v51 = vadd.f32 %v890_v43, %v461_v45 }
  0xef   : > { %v1022_v58 = vmax.f32 %v905_v50, 0.0  ;;  %v467_v50 = vperm.slane %v3998_v40, 6 }
  0xf0   : > { %v1021_v0 = vmax.f32 %v891_v51, 0.0 }
  0xf4   : > { %v906_v55 = vpop.f32.mrf.mxu1  ;;  %v918_v56 = vpop.f32.mrf.mxu2 }
  0xf5   : > { %v892_v59 = vpop.f32.mrf.mxu0  ;;  %v907_v61 = vadd.f32 %v906_v55, %v462_v44  ;;  %v932_v63 = vpop.f32.mrf.mxu3  ;;  %v919_v9 = vadd.f32 %v918_v56, %v463_v62 }
  0xf6   : > { %v893_v1 = vadd.f32 %v892_v59, %v461_v45  ;;  %v933_v12 = vadd.f32 %v932_v63, %v464_v2 }
  0xf7   : > { %v1032_v4 = vmax.f32 %v907_v61, 0.0  ;;  %v1023_v60 = vmax.f32 %v919_v9, 0.0  ;;  %v3211_v61 = vld [vmem:[%s3742_s30 + $0x200] sm:$0xff] }
  0xf8   : > { %v1031_v5 = vmax.f32 %v893_v1, 0.0  ;;  %v1024_v20 = vmax.f32 %v933_v12, 0.0 }
  0xf9   : > { %v1042_v8 = vpack.c.bf16 %v1032_v4, %v1022_v58 }
  0xfa   : > { %v1041_v11 = vpack.c.bf16 %v1031_v5, %v1021_v0 }
  0xfb   : > { %1717 = vmatmul.bf16.vlgmr.msra.gmra.mxu3 %v1042_v8  ;;  %v458_v8 = vld [vmem:[%s3760_s26 + $0x8] sm:$0x3] }
  0xfc   : > { %1703 = vmatmul.bf16.vlgmr.msra.gmra.mxu2 %v1041_v11  ;;  %v920_v14 = vpop.f32.mrf.mxu2  ;;  %1821 = vmatpush.bf16.msra.mxu3 %v3226_v6  ;;  %v469_v11 = vperm.slane %v458_v8, 0  ;;  %v470_v12 = vperm.slane %v458_v8, 1 }
  0xfd   : > { %v921_v17 = vadd.f32 %v920_v14, %v463_v62  ;;  %v934_v18 = vpop.f32.mrf.mxu3  ;;  %1807 = vmatpush.bf16.msra.mxu2 %v3218_v10 }
  0xfe   : > { %v935_v21 = vadd.f32 %v934_v18, %v464_v2 }
  0xff   : > { %v1033_v23 = vmax.f32 %v921_v17, 0.0 }
 0x100   : > { %v1034_v24 = vmax.f32 %v935_v21, 0.0  ;;  %1822 = vmatpush.bf16.msra.mxu3 %v3225_v15 }
 0x101   : > { %v1043_v26 = vpack.c.bf16 %v1033_v23, %v1023_v60  ;;  %1808 = vmatpush.bf16.msra.mxu2 %v3217_v19 }
 0x102   : > { %v1044_v28 = vpack.c.bf16 %v1034_v24, %v1024_v20 }
 0x103   : > { %1731 = vmatmul.bf16.vlgmr.msrb.gmra.mxu0 %v1043_v26  ;;  %v3292_v26 = vld [vmem:[%s338_s29] ss:$0 sm:$0xff] }
 0x104   : > { %1745 = vmatmul.bf16.vlgmr.msrb.gmra.mxu1 %v1044_v28  ;;  %1823 = vmatpush.bf16.msra.mxu3 %v3224_v25 }
 0x105   : > { %1809 = vmatpush.bf16.msra.mxu2 %v3216_v27 }
 0x108   : > { %1824 = vmatpush.bf16.msra.mxu3 %v3223_v29 }
 0x109   : > { %1810 = vmatpush.bf16.msra.mxu2 %v3215_v30 }
 0x10b   : > { %v946_v31 = vpop.f32.mrf.mxu0 }
 0x10c   : > { %v960_v33 = vpop.f32.mrf.mxu1  ;;  %v947_v37 = vadd.f32 %v946_v31, %v465_v32  ;;  %1825 = vmatpush.bf16.msra.mxu3 %v3222_v34 }
 0x10d   : > { %v961_v39 = vadd.f32 %v960_v33, %v466_v35  ;;  %1811 = vmatpush.bf16.msra.mxu2 %v3214_v36 }
 0x10e   : > { %v1025_v43 = vmax.f32 %v947_v37, 0.0 }
 0x10f   : > { %v1026_v48 = vmax.f32 %v961_v39, 0.0 }
 0x110   : > { %1826 = vmatpush.bf16.msra.mxu3 %v3221_v38 }
 0x111   : > { %1812 = vmatpush.bf16.msra.mxu2 %v3213_v41 }
 0x113   : > { %v948_v42 = vpop.f32.mrf.mxu0 }
 0x114   : > { %v949_v44 = vadd.f32 %v948_v42, %v465_v32  ;;  %v962_v45 = vpop.f32.mrf.mxu1  ;;  %v974_v46 = vpop.f32.mrf.mxu2  ;;  %1827 = vmatpush.bf16.msra.mxu3 %v3220_v47 }
 0x115   : > { %v963_v49 = vadd.f32 %v962_v45, %v466_v35  ;;  %v975_v59 = vadd.f32 %v974_v46, %v467_v50  ;;  %1813 = vmatpush.bf16.msra.mxu2 %v3212_v52 }
 0x116   : > { %v988_v51 = vpop.f32.mrf.mxu3  ;;  %v1035_v53 = vmax.f32 %v949_v44, 0.0 }
 0x117   : > { %v1036_v55 = vmax.f32 %v963_v49, 0.0  ;;  %v989_v62 = vadd.f32 %v988_v51, %v468_v54  ;;  %v1027_v0 = vmax.f32 %v975_v59, 0.0 }
 0x118   : > { %v1045_v56 = vpack.c.bf16 %v1035_v53, %v1025_v43  ;;  %1828 = vmatpush.bf16.msra.mxu3 %v3219_v57 }
 0x119   : > { %v1046_v58 = vpack.c.bf16 %v1036_v55, %v1026_v48  ;;  %1814 = vmatpush.bf16.msra.mxu2 %v3211_v61  ;;  %v1028_v3 = vmax.f32 %v989_v62, 0.0 }
 0x11a   : > { %1759 = vmatmul.bf16.vlgmr.msrb.gmra.mxu2 %v1045_v56 }
 0x11b   : > { %1773 = vmatmul.bf16.vlgmr.msrb.gmra.mxu3 %v1046_v58 }
 0x11c   : > { %v976_v63 = vpop.f32.mrf.mxu2 }
 0x11d   : > { %v977_v1 = vadd.f32 %v976_v63, %v467_v50 }
 0x11e   : > { %v990_v2 = vpop.f32.mrf.mxu3 }
 0x11f   : > { %v991_v40 = vadd.f32 %v990_v2, %v468_v54  ;;  %v1037_v4 = vmax.f32 %v977_v1, 0.0 }
 0x121   : > { %v1038_v5 = vmax.f32 %v991_v40, 0.0  ;;  %v1047_v6 = vpack.c.bf16 %v1037_v4, %v1027_v0 }
 0x123   : > { %v1048_v7 = vpack.c.bf16 %v1038_v5, %v1028_v3  ;;  %1787 = vmatmul.bf16.vlgmr.msra.gmra.mxu0 %v1047_v6 }
 0x125   : > { %1801 = vmatmul.bf16.vlgmr.msra.gmra.mxu1 %v1048_v7 }
 0x12b   : > { %v1002_v9 = vpop.f32.mrf.mxu0 }
 0x12c   : > { %v1016_v10 = vpop.f32.mrf.mxu1  ;;  %v1003_v13 = vadd.f32 %v1002_v9, %v469_v11 }
 0x12d   : > { %v1017_v14 = vadd.f32 %v1016_v10, %v470_v12 }
 0x12e   : > { %v1029_v18 = vmax.f32 %v1003_v13, 0.0 }
 0x12f   : > { %v1030_v20 = vmax.f32 %v1017_v14, 0.0 }
 0x133   : > { %v1004_v15 = vpop.f32.mrf.mxu0 }
 0x134   : > { %v1005_v16 = vadd.f32 %v1004_v15, %v469_v11  ;;  %v1018_v60 = vpop.f32.mrf.mxu1 }
 0x135   : > { %v1019_v17 = vadd.f32 %v1018_v60, %v470_v12 }
 0x136   : > { %v1039_v19 = vmax.f32 %v1005_v16, 0.0 }
 0x137   : > { %v1040_v21 = vmax.f32 %v1019_v17, 0.0 }
 0x138   : > { %v1049_v22 = vpack.c.bf16 %v1039_v19, %v1029_v18 }
 0x139   : > { %v1050_v23 = vpack.c.bf16 %v1040_v21, %v1030_v20 }
 0x13a   : > { %1815 = vmatmul.bf16.vlgmr.msra.gmra.mxu2 %v1049_v22 }
 0x13b   : > { %1829 = vmatmul.bf16.vlgmr.msra.gmra.mxu3 %v1050_v23 }
 0x17e   : > { %v1718_v24 = vpop.f32.mrf.mxu3 }
 0x17f   : > { %v1704_v25 = vpop.f32.mrf.mxu2 }
 0x180   : > { %v1732_v27 = vpop.f32.mrf.mxu0  ;;  %v1705_v28 = vadd.f32 %v3292_v26, %v1704_v25 }
 0x181   : > { %v1746_v31 = vpop.f32.mrf.mxu1 }
 0x182   : > { %v1719_v32 = vadd.f32 %v1718_v24, %v1705_v28 }
 0x184   : > { %v1733_v33 = vadd.f32 %v1732_v27, %v1719_v32 }
 0x186   : > { %v1720_v29 = vpop.f32.mrf.mxu3  ;;  %v1747_v38 = vadd.f32 %v1746_v31, %v1733_v33 }
 0x187   : > { %v1706_v30 = vpop.f32.mrf.mxu2 }
 0x188   : > { %v1707_v34 = vadd.f32 %v3292_v26, %v1706_v30  ;;  %v1734_v35 = vpop.f32.mrf.mxu0 }
 0x189   : > { %v1748_v41 = vpop.f32.mrf.mxu1 }
 0x18a   : > { %v1721_v39 = vadd.f32 %v1720_v29, %v1707_v34 }
 0x18c   : > { %v1735_v43 = vadd.f32 %v1734_v35, %v1721_v39 }
 0x18e   : > { %v1749_v47 = vadd.f32 %v1748_v41, %v1735_v43 }
 0x19d   : > { %v1760_v36 = vpop.f32.mrf.mxu2 }
 0x19e   : > { %v1774_v37 = vpop.f32.mrf.mxu3  ;;  %v1761_v42 = vadd.f32 %v1760_v36, %v1747_v38 }
 0x1a0   : > { %v1788_v44 = vpop.f32.mrf.mxu0  ;;  %v1775_v45 = vadd.f32 %v1774_v37, %v1761_v42 }
 0x1a2   : > { %v1802_v49 = vpop.f32.mrf.mxu1  ;;  %v1789_v50 = vadd.f32 %v1788_v44, %v1775_v45 }
 0x1a4   : > { %v1803_v52 = vadd.f32 %v1802_v49, %v1789_v50 }
 0x1a5   : > { %v1762_v46 = vpop.f32.mrf.mxu2 }
 0x1a6   : > { %v1776_v48 = vpop.f32.mrf.mxu3  ;;  %v1763_v51 = vadd.f32 %v1762_v46, %v1749_v47 }
 0x1a8   : > { %v1777_v53 = vadd.f32 %v1776_v48, %v1763_v51  ;;  %v1790_v54 = vpop.f32.mrf.mxu0 }
 0x1aa   : > { %v1791_v58 = vadd.f32 %v1790_v54, %v1777_v53  ;;  %v1804_v61 = vpop.f32.mrf.mxu1 }
 0x1ac   : > { %v1805_v62 = vadd.f32 %v1804_v61, %v1791_v58 }
 0x1bd   : > { %v1816_v55 = vpop.f32.mrf.mxu2 }
 0x1be   : > { %v1817_v56 = vadd.f32 %v1816_v55, %v1803_v52  ;;  %v1830_v57 = vpop.f32.mrf.mxu3 }
 0x1c0   : > { %v1831_v59 = vadd.f32 %v1830_v57, %v1817_v56 }
 0x1c2   : > { %1835 = vst [vmem:[#allocation2] sm:$0xff] %v1831_v59 }
 0x1c5   : > { %v1818_v63 = vpop.f32.mrf.mxu2 }
 0x1c6   : > { %v1819_v0 = vadd.f32 %v1818_v63, %v1805_v62  ;;  %v1832_v1 = vpop.f32.mrf.mxu3  ;;  %1840 = sbr.rel (%p3058_p7) target bundleno = 1233 (0x4d1), region = 68 }
 0x1c8   : > { %v4044_v2 = vadd.f32 %v1832_v1, %v1819_v0 }
 0x1ca   : > { %1836 = vst [vmem:[#allocation2 + $0x8] sm:$0xff] %v4044_v2 }
 0x1cb   : > { %v1841_v3 = vmul.f32 %v1831_v59, %v1831_v59  ;;  %v1871_v40 = vld [vmem:[%s4156_s0] sm:$0xff]  ;;  %v1872_v5 = vld [vmem:[%s4156_s0 + $0x8] sm:$0xff]  ;;  %v1842_v6 = vmul.f32 %v4044_v2, %v4044_v2 }
 0x1cc   : > { %v1873_v4 = vmul.f32 %v1871_v40, %v1871_v40  ;;  %v1874_v7 = vmul.f32 %v1872_v5, %v1872_v5 }
 0x1cd   : > { %1843 = vadd.xlane.f32.xlu1 %v1841_v3 }
 0x1ce   : > { %1875 = vadd.xlane.f32.xlu0 %v1873_v4 }
 0x1d5   : > { %1845 = vadd.xlane.f32.xlu1 %v1842_v6 }
 0x1d6   : > { %1877 = vadd.xlane.f32.xlu0 %v1874_v7 }
 0x240   : > { %v1844_v8 = vpop.xlane.xlu1 %1843 }
 0x241   : > { %v1847_v9 = vmax.f32 %v1844_v8, 1e-24  ;;  %v1876_v10 = vpop.xlane.xlu0 %1875 }
 0x242   : > { %v1879_v11 = vmax.f32 %v1876_v10, 1e-24 }
 0x243   : > { %3293 = vrsqrt.f32 %v1847_v9  ;;  %vm1855_vm2 = vweird.f32 %v1847_v9 }
 0x244   : > { %3295 = vrsqrt.f32 %v1879_v11  ;;  %vm1887_vm4 = vweird.f32 %v1879_v11 }
 0x248   : > { %v1846_v12 = vpop.xlane.xlu1 %1845 }
 0x249   : > { %v3294_v13 = vpop.eup %3293  ;;  %v1848_v14 = vmax.f32 %v1846_v12, 1e-24  ;;  %v1878_v15 = vpop.xlane.xlu0 %1877 }
 0x24a   : > { %v3296_v16 = vpop.eup %3295  ;;  %v1850_v60 = vmul.f32 %v3294_v13, %v1847_v9  ;;  %v1880_v17 = vmax.f32 %v1878_v15, 1e-24  ;;  %vm1856_vm0 = vweird.f32 %v3294_v13 }
 0x24b   : > { %v1882_v18 = vmul.f32 %v3296_v16, %v1879_v11  ;;  %3297 = vrsqrt.f32 %v1848_v14  ;;  %vm1888_vm1 = vweird.f32 %v3296_v16  ;;  %vm1857_vm3 = vmor %vm1855_vm2, %vm1856_vm0  ;;  %vm1865_vm8 = vweird.f32 %v1848_v14 }
 0x24c   : > { %v1851_v19 = vmul.f32 %v3294_v13, %v1850_v60  ;;  %3299 = vrsqrt.f32 %v1880_v17  ;;  %vm1889_vm5 = vmor %vm1887_vm4, %vm1888_vm1  ;;  %vm1897_vm10 = vweird.f32 %v1880_v17 }
 0x24d   : > { %v1883_v20 = vmul.f32 %v3296_v16, %v1882_v18 }
 0x24e   : > { %v1852_v21 = vmul.f32 0.5, %v1851_v19 }
 0x24f   : > { %v1884_v22 = vmul.f32 0.5, %v1883_v20 }
 0x250   : > { %v1853_v23 = vsub.f32 1.5, %v1852_v21 }
 0x251   : > { %v3298_v24 = vpop.eup %3297  ;;  %v1885_v25 = vsub.f32 1.5, %v1884_v22 }
 0x252   : > { %v3300_v26 = vpop.eup %3299  ;;  %v1854_v27 = vmul.f32 %v3294_v13, %v1853_v23  ;;  %v1860_v28 = vmul.f32 %v3298_v24, %v1848_v14  ;;  %vm1866_vm6 = vweird.f32 %v3298_v24 }
 0x253   : > { %v1886_v29 = vmul.f32 %v3296_v16, %v1885_v25  ;;  %v1892_v30 = vmul.f32 %v3300_v26, %v1880_v17  ;;  %vm1898_vm7 = vweird.f32 %v3300_v26  ;;  %vm1867_vm9 = vmor %vm1865_vm8, %vm1866_vm6 }
 0x254   : > { %v1858_v31 = vsel %vm1857_vm3, %v3294_v13, %v1854_v27  ;;  %v1861_v32 = vmul.f32 %v3298_v24, %v1860_v28  ;;  %vm1899_vm11 = vmor %vm1897_vm10, %vm1898_vm7 }
 0x255   : > { %v4056_v33 = vmul.f32 %v1858_v31, %v1831_v59  ;;  %v1890_v34 = vsel %vm1889_vm5, %v3296_v16, %v1886_v29  ;;  %v1893_v35 = vmul.f32 %v3300_v26, %v1892_v30 }
 0x256   : > { %v4058_v36 = vmul.f32 %v1890_v34, %v1871_v40  ;;  %v1862_v37 = vmul.f32 0.5, %v1861_v32 }
 0x257   : > { %v1894_v38 = vmul.f32 0.5, %v1893_v35 }
 0x258   : > { %1903 = vst [vmem:[#allocation5] sm:$0xff] %v4058_v36  ;;  %v1863_v39 = vsub.f32 1.5, %v1862_v37 }
 0x259   : > { %v1895_v41 = vsub.f32 1.5, %v1894_v38 }
 0x25a   : > { %v1864_v42 = vmul.f32 %v3298_v24, %v1863_v39 }
 0x25b   : > { %v1896_v43 = vmul.f32 %v3300_v26, %v1895_v41 }
 0x25c   : > { %v1868_v44 = vsel %vm1867_vm9, %v3298_v24, %v1864_v42 }
 0x25d   : > { %v4062_v45 = vmul.f32 %v1868_v44, %v4044_v2  ;;  %v1900_v46 = vsel %vm1899_vm11, %v3300_v26, %v1896_v43 }
 0x25e   : > { %v4064_v47 = vmul.f32 %v1900_v46, %v1872_v5 }
 0x260   : > { %1904 = vst [vmem:[#allocation6] sm:$0xff] %v4064_v47 }
 0x261   : > { %3541 = dma.done.wait [#allocation7], 2048 }
 0x262   : > { %3542 = vsyncadd [#allocation7], 4294965248 }
 0x263   : > { %3543 = dma.done.wait [#allocation7 + $0x1], 2048 }
 0x264   : > { %3544 = vsyncadd [#allocation7 + $0x1], 4294965248  ;;  %1963 = vmatpush.xpose.msra.mxu1 %v4058_v36  ;;  %2129 = vmatpush.xpose.msra.mxu3 %v4064_v47  ;;  %v1926_v48 = vld [vmem:[#allocation3 + $0x78] sm:$0xff]  ;;  %v1925_v50 = vld [vmem:[#allocation3 + $0x70] sm:$0xff]  ;;  %vm2013_vm12 = vcmask 64512   ;;  %s2245_s23 = sld [smem:[#allocation9]] }
 0x265   : > { %v2092_v49 = vld [vmem:[#allocation4 + $0x78] sm:$0xff]  ;;  %1927 = vmatpush.xpose.msra.mxu0 %v1926_v48  ;;  %1969 = vmatpush.xpose.msra.mxu2 %v1926_v48  ;;  %v2091_v51 = vld [vmem:[#allocation4 + $0x70] sm:$0xff]  ;;  %v1924_v52 = vld [vmem:[#allocation3 + $0x68] sm:$0xff]  ;;  %s3575_s1 = smov [#allocation5]   ;;  %s3457_s27 = scalar_lea.hbm %s4165_s9, 128 }
 0x266   : > { %v2090_v53 = vld [vmem:[#allocation4 + $0x68] sm:$0xff]  ;;  %v1923_v54 = vld [vmem:[#allocation3 + $0x60] sm:$0xff]  ;;  %v1922_v56 = vld [vmem:[#allocation3 + $0x58] sm:$0xff]  ;;  %s2254_s24 = sshll.u32 %s3575_s1, 4  ;;  %s2255_s24 = int_to_ptr.vmem [resolvable:$true] %s2254_s24 }
 0x267   : > { %2130 = vmatmul.f32.vlgmr.msra.gmra.mxu3 %v4064_v47  ;;  %1964 = vmatmul.f32.vlgmr.msra.gmra.mxu1 %v4058_v36  ;;  %v2089_v55 = vld [vmem:[#allocation4 + $0x60] sm:$0xff]  ;;  %v2088_v57 = vld [vmem:[#allocation4 + $0x58] sm:$0xff]  ;;  %v1921_v58 = vld [vmem:[#allocation3 + $0x50] sm:$0xff] }
 0x268   : > { %2093 = vmatpush.xpose.msrb.mxu1 %v2092_v49  ;;  %2135 = vmatpush.xpose.msrb.mxu3 %v2092_v49  ;;  %v2087_v59 = vld [vmem:[#allocation4 + $0x50] sm:$0xff]  ;;  %v1920_v61 = vld [vmem:[#allocation3 + $0x48] sm:$0xff]  ;;  %v1919_v63 = vld [vmem:[#allocation3 + $0x40] sm:$0xff] }
 0x269   : > { %1928 = vmatpush.xpose.msra.mxu0 %v1925_v50  ;;  %1970 = vmatpush.xpose.msra.mxu2 %v1925_v50  ;;  %v2086_v62 = vld [vmem:[#allocation4 + $0x48] sm:$0xff]  ;;  %v2085_v0 = vld [vmem:[#allocation4 + $0x40] sm:$0xff]  ;;  %v1918_v1 = vld [vmem:[#allocation3 + $0x38] sm:$0xff] }
 0x26a   : > { %v2084_v2 = vld [vmem:[#allocation4 + $0x38] sm:$0xff]  ;;  %v1917_v3 = vld [vmem:[#allocation3 + $0x30] sm:$0xff]  ;;  %v1916_v4 = vld [vmem:[#allocation3 + $0x28] sm:$0xff]  ;;  %s2246_s14 = scalar_lea.hbm %s4165_s9, %s2245_s23 }
 0x26b   : > { %v2083_v40 = vld [vmem:[#allocation4 + $0x30] sm:$0xff]  ;;  %v2082_v5 = vld [vmem:[#allocation4 + $0x28] sm:$0xff]  ;;  %v1915_v6 = vld [vmem:[#allocation3 + $0x20] sm:$0xff]  ;;  %s2256_s21 = sshll.u32 %s2246_s14, 4  ;;  %s2257_s21 = int_to_ptr.hbm [resolvable:$true] %s2256_s21 }
 0x26c   : > { %2094 = vmatpush.xpose.msrb.mxu1 %v2091_v51  ;;  %2136 = vmatpush.xpose.msrb.mxu3 %v2091_v51  ;;  %v2081_v7 = vld [vmem:[#allocation4 + $0x20] sm:$0xff]  ;;  %v1914_v8 = vld [vmem:[#allocation3 + $0x18] sm:$0xff]  ;;  %v1913_v10 = vld [vmem:[#allocation3 + $0x10] sm:$0xff]  ;;  %s3453_s28 = sshra.s32 %s2257_s21, 4  ;;  %s3454_s28 = int_to_ptr.hbm [resolvable:$true] %s3453_s28 }
 0x26d   : > { %1929 = vmatpush.xpose.msra.mxu0 %v1924_v52  ;;  %1971 = vmatpush.xpose.msra.mxu2 %v1924_v52  ;;  %v2080_v9 = vld [vmem:[#allocation4 + $0x18] sm:$0xff]  ;;  %v2079_v11 = vld [vmem:[#allocation4 + $0x10] sm:$0xff]  ;;  %v1912_v12 = vld [vmem:[#allocation3 + $0x8] sm:$0xff]  ;;  %s3455_s11 = scalar_lea.hbm %s3454_s28, 8  ;;  %p3458_p3 = scmp.lt.s32.totalorder %s3454_s28, %s4165_s9 }
 0x26e   : > { %v2078_v13 = vld [vmem:[#allocation4 + $0x8] sm:$0xff]  ;;  %v1911_v14 = vld [vmem:[#allocation3] sm:$0xff]  ;;  %p3456_p2 = scmp.ne.s32.totalorder %s3454_s28, %s3455_s11  ;;  %p3459_p4 = scmp.lt.s32.totalorder %s3457_s27, %s3455_s11 }
 0x26f   : > { %v2077_v15 = vld [vmem:[#allocation4] sm:$0xff] }
 0x270   : > { %2095 = vmatpush.xpose.msrb.mxu1 %v2090_v53  ;;  %2137 = vmatpush.xpose.msrb.mxu3 %v2090_v53  ;;  %p3460_p5 = por %p3459_p4, %p3458_p3 }
 0x271   : > { %1930 = vmatpush.xpose.msra.mxu0 %v1923_v54  ;;  %1972 = vmatpush.xpose.msra.mxu2 %v1923_v54 }
 0x272   : > { %p3461_p6 = pnand %p3460_p5, %p3456_p2 }
 0x274   : > { %2096 = vmatpush.xpose.msrb.mxu1 %v2089_v55  ;;  %2138 = vmatpush.xpose.msrb.mxu3 %v2089_v55 }
 0x275   : > { %1931 = vmatpush.xpose.msra.mxu0 %v1922_v56  ;;  %1973 = vmatpush.xpose.msra.mxu2 %v1922_v56 }
 0x278   : > { %2097 = vmatpush.xpose.msrb.mxu1 %v2088_v57  ;;  %2139 = vmatpush.xpose.msrb.mxu3 %v2088_v57 }
 0x279   : > { %1932 = vmatpush.xpose.msra.mxu0 %v1921_v58  ;;  %1974 = vmatpush.xpose.msra.mxu2 %v1921_v58 }
 0x27c   : > { %2098 = vmatpush.xpose.msrb.mxu1 %v2087_v59  ;;  %2140 = vmatpush.xpose.msrb.mxu3 %v2087_v59 }
 0x27d   : > { %1933 = vmatpush.xpose.msra.mxu0 %v1920_v61  ;;  %1975 = vmatpush.xpose.msra.mxu2 %v1920_v61 }
 0x280   : > { %2099 = vmatpush.xpose.msrb.mxu1 %v2086_v62  ;;  %2141 = vmatpush.xpose.msrb.mxu3 %v2086_v62 }
 0x281   : > { %1934 = vmatpush.xpose.msra.mxu0 %v1919_v63  ;;  %1976 = vmatpush.xpose.msra.mxu2 %v1919_v63 }
 0x284   : > { %2100 = vmatpush.xpose.msrb.mxu1 %v2085_v0  ;;  %2142 = vmatpush.xpose.msrb.mxu3 %v2085_v0 }
 0x285   : > { %1935 = vmatpush.xpose.msra.mxu0 %v1918_v1  ;;  %1977 = vmatpush.xpose.msra.mxu2 %v1918_v1 }
 0x288   : > { %2101 = vmatpush.xpose.msrb.mxu1 %v2084_v2  ;;  %2143 = vmatpush.xpose.msrb.mxu3 %v2084_v2 }
 0x289   : > { %1936 = vmatpush.xpose.msra.mxu0 %v1917_v3  ;;  %1978 = vmatpush.xpose.msra.mxu2 %v1917_v3 }
 0x28c   : > { %2102 = vmatpush.xpose.msrb.mxu1 %v2083_v40  ;;  %2144 = vmatpush.xpose.msrb.mxu3 %v2083_v40 }
 0x28d   : > { %1937 = vmatpush.xpose.msra.mxu0 %v1916_v4  ;;  %1979 = vmatpush.xpose.msra.mxu2 %v1916_v4 }
 0x290   : > { %2103 = vmatpush.xpose.msrb.mxu1 %v2082_v5  ;;  %2145 = vmatpush.xpose.msrb.mxu3 %v2082_v5 }
 0x291   : > { %1938 = vmatpush.xpose.msra.mxu0 %v1915_v6  ;;  %1980 = vmatpush.xpose.msra.mxu2 %v1915_v6 }
 0x294   : > { %2104 = vmatpush.xpose.msrb.mxu1 %v2081_v7  ;;  %2146 = vmatpush.xpose.msrb.mxu3 %v2081_v7 }
 0x295   : > { %1939 = vmatpush.xpose.msra.mxu0 %v1914_v8  ;;  %1981 = vmatpush.xpose.msra.mxu2 %v1914_v8 }
 0x298   : > { %2105 = vmatpush.xpose.msrb.mxu1 %v2080_v9  ;;  %2147 = vmatpush.xpose.msrb.mxu3 %v2080_v9 }
 0x299   : > { %1940 = vmatpush.xpose.msra.mxu0 %v1913_v10  ;;  %1982 = vmatpush.xpose.msra.mxu2 %v1913_v10 }
 0x29c   : > { %2106 = vmatpush.xpose.msrb.mxu1 %v2079_v11  ;;  %2148 = vmatpush.xpose.msrb.mxu3 %v2079_v11 }
 0x29d   : > { %1941 = vmatpush.xpose.msra.mxu0 %v1912_v12  ;;  %1983 = vmatpush.xpose.msra.mxu2 %v1912_v12 }
 0x2a0   : > { %2107 = vmatpush.xpose.msrb.mxu1 %v2078_v13  ;;  %2149 = vmatpush.xpose.msrb.mxu3 %v2078_v13 }
 0x2a1   : > { %1942 = vmatpush.xpose.msra.mxu0 %v1911_v14  ;;  %1984 = vmatpush.xpose.msra.mxu2 %v1911_v14 }
 0x2a4   : > { %2108 = vmatpush.xpose.msrb.mxu1 %v2077_v15  ;;  %2150 = vmatpush.xpose.msrb.mxu3 %v2077_v15 }
 0x2a5   : > { %2005 = vmatpush.xpose.msrb.mxu2 %v4058_v36  ;;  %2171 = vmatpush.xpose.msrb.mxu0 %v4064_v47 }
 0x2a6   : > { %1943 = vmatmul.f32.vlgmr.msra.gmra.mxu0 %v4058_v36  ;;  %1985 = vmatmul.f32.vlgmr.msra.gmra.mxu2 %v4062_v45 }
 0x2a7   : > { %2109 = vmatmul.f32.vlgmr.msrb.gmra.mxu1 %v4064_v47  ;;  %2151 = vmatmul.f32.vlgmr.msrb.gmra.mxu3 %v4056_v33 }
 0x2ae   : > { %2006 = vmatmul.f32.vlgmr.msrb.gmra.mxu2 %v4062_v45  ;;  %2172 = vmatmul.f32.vlgmr.msrb.gmra.mxu0 %v4056_v33 }
 0x2e4   : > { %v1965_v16 = vpop.f32.mrf.mxu1 }
 0x2e5   : > { %v1968_v60 = vmul.f32 20.0, %v1965_v16 }
 0x2e7   : > { %v2014_v17 = vsel %vm2013_vm12, %v1968_v60, -inf }
 0x2e8   : > { %2015 = vmax.xlane.f32.xlu0 %v2014_v17 }
 0x2ea   : > { %v2131_v18 = vpop.f32.mrf.mxu3 }
 0x2eb   : > { %v2134_v19 = vmul.f32 20.0, %v2131_v18 }
 0x2ed   : > { %v2179_v20 = vsel %vm2013_vm12, %v2134_v19, -inf }
 0x2ee   : > { %2180 = vmax.xlane.f32.xlu1 %v2179_v20 }
 0x323   : > { %v1944_v21 = vpop.f32.mrf.mxu0 }
 0x324   : > { %v1947_v22 = vmul.f32 20.0, %v1944_v21  ;;  %v2110_v23 = vpop.f32.mrf.mxu1 }
 0x325   : > { %v2113_v24 = vmul.f32 20.0, %v2110_v23 }
 0x326   : > { %2011 = vmax.xlane.f32.xlu0 %v1947_v22 }
 0x327   : > { %2177 = vmax.xlane.f32.xlu1 %v2113_v24 }
 0x329   : > { %v1986_v25 = vpop.f32.mrf.mxu2 }
 0x32a   : > { %v1989_v26 = vmul.f32 20.0, %v1986_v25  ;;  %v2152_v28 = vpop.f32.mrf.mxu3 }
 0x32b   : > { %v2173_v27 = vpop.f32.mrf.mxu0  ;;  %v2155_v30 = vmul.f32 20.0, %v2152_v28 }
 0x32c   : > { %v2176_v29 = vmul.f32 20.0, %v2173_v27  ;;  %2032 = vmax.xlane.f32.xlu2 %v1989_v26 }
 0x32e   : > { %v2199_v31 = vsel %vm2013_vm12, %v2176_v29, -inf  ;;  %2197 = vmax.xlane.f32.xlu0 %v2155_v30 }
 0x32f   : > { %2200 = vmax.xlane.f32.xlu1 %v2199_v31 }
 0x331   : > { %v2007_v32 = vpop.f32.mrf.mxu2 }
 0x332   : > { %v2010_v33 = vmul.f32 20.0, %v2007_v32 }
 0x334   : > { %v2034_v34 = vsel %vm2013_vm12, %v2010_v33, -inf }
 0x335   : > { %2035 = vmax.xlane.f32.xlu2 %v2034_v34 }
 0x35b   : > { %v2016_v35 = vpop.xlane.xlu0 %2015 }
 0x361   : > { %v2181_v36 = vpop.xlane.xlu1 %2180 }
 0x399   : > { %v2012_v37 = vpop.xlane.xlu0 %2011 }
 0x39a   : > { %v2178_v38 = vpop.xlane.xlu1 %2177  ;;  %v2017_v39 = vmax.f32 %v2012_v37, %v2016_v35 }
 0x39b   : > { %v2182_v41 = vmax.f32 %v2178_v38, %v2181_v36 }
 0x39c   : > { %v4083_v42 = vsub.f32 %v1947_v22, %v2017_v39  ;;  %v4085_v43 = vsub.f32 %v1968_v60, %v2017_v39 }
 0x39d   : > { %v4087_v44 = vsub.f32 %v2113_v24, %v2182_v41  ;;  %v4089_v45 = vsub.f32 %v2134_v19, %v2182_v41 }
 0x39e   : > { %v2019_v46 = vmul.f32 1.442695, %v4083_v42  ;;  %v2024_v48 = vmul.f32 1.442695, %v4085_v43 }
 0x39f   : > { %v2184_v47 = vmul.f32 1.442695, %v4087_v44  ;;  %v2033_v49 = vpop.xlane.xlu2 %2032  ;;  %v2189_v50 = vmul.f32 1.442695, %v4089_v45 }
 0x3a0   : > { %3301 = vpow2.f32 %v2019_v46 }
 0x3a1   : > { %3303 = vpow2.f32 %v2184_v47  ;;  %v2198_v51 = vpop.xlane.xlu0 %2197 }
 0x3a2   : > { %v2201_v52 = vpop.xlane.xlu1 %2200  ;;  %3305 = vpow2.f32 %v2024_v48 }
 0x3a3   : > { %v2202_v53 = vmax.f32 %v2198_v51, %v2201_v52  ;;  %3307 = vpow2.f32 %v2189_v50 }
 0x3a5   : > { %v4095_v55 = vsub.f32 %v2155_v30, %v2202_v53  ;;  %v4103_v2 = vsub.f32 %v2176_v29, %v2202_v53 }
 0x3a6   : > { %v3302_v54 = vpop.eup %3301 }
 0x3a7   : > { %v3304_v56 = vpop.eup %3303  ;;  %2021 = vadd.xlane.f32.xlu2 %v3302_v54  ;;  %v2204_v61 = vmul.f32 1.442695, %v4095_v55  ;;  %v2209_v5 = vmul.f32 1.442695, %v4103_v2 }
 0x3a8   : > { %2186 = vadd.xlane.f32.xlu1 %v3304_v56  ;;  %v2036_v57 = vpop.xlane.xlu2 %2035  ;;  %v3306_v58 = vpop.eup %3305 }
 0x3a9   : > { %v2037_v59 = vmax.f32 %v2033_v49, %v2036_v57  ;;  %v2026_v62 = vsel %vm2013_vm12, %v3306_v58, 0.0  ;;  %v3308_v63 = vpop.eup %3307  ;;  %3309 = vpow2.f32 %v2204_v61 }
 0x3aa   : > { %2027 = vadd.xlane.f32.xlu0 %v2026_v62  ;;  %v2191_v4 = vsel %vm2013_vm12, %v3308_v63, 0.0 }
 0x3ab   : > { %v4099_v0 = vsub.f32 %v1989_v26, %v2037_v59  ;;  %v4101_v1 = vsub.f32 %v2010_v33, %v2037_v59 }
 0x3ad   : > { %v2039_v3 = vmul.f32 1.442695, %v4099_v0  ;;  %v2044_v40 = vmul.f32 1.442695, %v4101_v1 }
 0x3af   : > { %3311 = vpow2.f32 %v2039_v3  ;;  %2192 = vadd.xlane.f32.xlu2 %v2191_v4  ;;  %v3310_v6 = vpop.eup %3309 }
 0x3b0   : > { %3313 = vpow2.f32 %v2044_v40 }
 0x3b1   : > { %3315 = vpow2.f32 %v2209_v5 }
 0x3b5   : > { %v3312_v7 = vpop.eup %3311 }
 0x3b6   : > { %v3314_v8 = vpop.eup %3313  ;;  %2041 = vadd.xlane.f32.xlu0 %v3312_v7 }
 0x3b7   : > { %v2046_v9 = vsel %vm2013_vm12, %v3314_v8, 0.0  ;;  %2206 = vadd.xlane.f32.xlu2 %v3310_v6  ;;  %v3316_v10 = vpop.eup %3315 }
 0x3b8   : > { %2047 = vadd.xlane.f32.xlu1 %v2046_v9  ;;  %v2211_v11 = vsel %vm2013_vm12, %v3316_v10, 0.0 }
 0x3be   : > { %2212 = vadd.xlane.f32.xlu0 %v2211_v11 }
 0x41a   : > { %v2022_v12 = vpop.xlane.xlu2 %2021 }
 0x41b   : > { %v2187_v15 = vpop.xlane.xlu1 %2186 }
 0x41d   : > { %v2028_v13 = vpop.xlane.xlu0 %2027 }
 0x41e   : > { %v2029_v14 = vadd.f32 %v2028_v13, %v2022_v12 }
 0x420   : > { %3317 = vlog2.f32 %v2029_v14 }
 0x422   : > { %v2193_v16 = vpop.xlane.xlu2 %2192 }
 0x423   : > { %v2194_v60 = vadd.f32 %v2193_v16, %v2187_v15 }
 0x425   : > { %3319 = vlog2.f32 %v2194_v60 }
 0x426   : > { %v3318_v17 = vpop.eup %3317 }
 0x427   : > { %v2031_v18 = vmul.f32 0.6931472, %v3318_v17 }
 0x429   : > { %v2042_v19 = vpop.xlane.xlu0 %2041  ;;  %v2052_v23 = vsub.f32 %v4083_v42, %v2031_v18  ;;  %v2060_v25 = vsub.f32 %v4085_v43, %v2031_v18 }
 0x42a   : > { %v2207_v28 = vpop.xlane.xlu2 %2206 }
 0x42b   : > { %v3320_v20 = vpop.eup %3319  ;;  %v2048_v21 = vpop.xlane.xlu1 %2047  ;;  %v2054_v26 = vmul.f32 1.442695, %v2052_v23  ;;  %v2062_v30 = vmul.f32 1.442695, %v2060_v25 }
 0x42c   : > { %v2049_v22 = vadd.f32 %v2048_v21, %v2042_v19  ;;  %v2196_v24 = vmul.f32 0.6931472, %v3320_v20 }
 0x42e   : > { %3321 = vlog2.f32 %v2049_v22  ;;  %v2217_v27 = vsub.f32 %v4087_v44, %v2196_v24  ;;  %v2225_v31 = vsub.f32 %v4089_v45, %v2196_v24 }
 0x430   : > { %v2219_v33 = vmul.f32 1.442695, %v2217_v27  ;;  %v2227_v35 = vmul.f32 1.442695, %v2225_v31 }
 0x431   : > { %v2213_v29 = vpop.xlane.xlu0 %2212 }
 0x432   : > { %v2214_v32 = vadd.f32 %v2213_v29, %v2207_v28 }
 0x434   : > { %3323 = vlog2.f32 %v2214_v32  ;;  %v3322_v34 = vpop.eup %3321 }
 0x435   : > { %3325 = vpow2.f32 %v2054_v26  ;;  %v2051_v36 = vmul.f32 0.6931472, %v3322_v34 }
 0x436   : > { %3327 = vpow2.f32 %v2062_v30 }
 0x437   : > { %3329 = vpow2.f32 %v2219_v33  ;;  %v2053_v37 = vsub.f32 %v4099_v0, %v2051_v36  ;;  %v2061_v38 = vsub.f32 %v4101_v1, %v2051_v36 }
 0x438   : > { %3331 = vpow2.f32 %v2227_v35 }
 0x439   : > { %v2056_v43 = vsub.f32 %v2052_v23, %v2053_v37  ;;  %v2064_v44 = vsub.f32 %v2060_v25, %v2061_v38 }
 0x43a   : > { %v3324_v39 = vpop.eup %3323 }
 0x43b   : > { %v3326_v41 = vpop.eup %3325  ;;  %v2216_v42 = vmul.f32 0.6931472, %v3324_v39 }
 0x43c   : > { %v3328_v45 = vpop.eup %3327  ;;  %v2057_v48 = vmul.f32 %v3326_v41, %v2056_v43 }
 0x43d   : > { %v2218_v46 = vsub.f32 %v4095_v55, %v2216_v42  ;;  %v2226_v47 = vsub.f32 %v4103_v2, %v2216_v42  ;;  %v2065_v49 = vmul.f32 %v3328_v45, %v2064_v44  ;;  %v3330_v50 = vpop.eup %3329 }
 0x43e   : > { %2058 = vadd.xlane.f32.xlu1 %v2057_v48  ;;  %v3332_v54 = vpop.eup %3331 }
 0x43f   : > { %v2066_v51 = vsel %vm2013_vm12, %v2065_v49, 0.0  ;;  %v2221_v52 = vsub.f32 %v2217_v27, %v2218_v46  ;;  %v2229_v53 = vsub.f32 %v2225_v31, %v2226_v47 }
 0x440   : > { %2067 = vadd.xlane.f32.xlu2 %v2066_v51 }
 0x441   : > { %v2222_v56 = vmul.f32 %v3330_v50, %v2221_v52  ;;  %v2230_v57 = vmul.f32 %v3332_v54, %v2229_v53 }
 0x443   : > { %2223 = vadd.xlane.f32.xlu0 %v2222_v56  ;;  %v2231_v58 = vsel %vm2013_vm12, %v2230_v57, 0.0 }
 0x446   : > { %2232 = vadd.xlane.f32.xlu1 %v2231_v58 }
 0x447   : > { %3464 = shalt.err (!%p3461_p6)  }
 0x448   : > { %2259 = dma.vmem_to_hbm [thread:$0]  %s2255_s24, 128, %s2257_s21, [#allocation8] }
 0x449   : > { %s2260_s17 = scalar_lea.hbm %s4166_s10, %s2245_s23  ;;  %s3576_s29 = smov [#allocation6]  }
 0x44a   : > { %s2269_s18 = sshll.u32 %s3576_s29, 4  ;;  %s2271_s26 = sshll.u32 %s2260_s17, 4  ;;  %s2270_s18 = int_to_ptr.vmem [resolvable:$true] %s2269_s18  ;;  %s2272_s26 = int_to_ptr.hbm [resolvable:$true] %s2271_s26 }
 0x44b   : > { %s3477_s12 = sshra.s32 %s2272_s26, 4  ;;  %s3481_s28 = scalar_lea.hbm %s4166_s10, 128  ;;  %s3478_s12 = int_to_ptr.hbm [resolvable:$true] %s3477_s12 }
 0x44c   : > { %s3479_s13 = scalar_lea.hbm %s3478_s12, 8  ;;  %p3482_p12 = scmp.lt.s32.totalorder %s3478_s12, %s4166_s10 }
 0x44d   : > { %p3480_p10 = scmp.ne.s32.totalorder %s3478_s12, %s3479_s13  ;;  %p3483_p9 = scmp.lt.s32.totalorder %s3481_s28, %s3479_s13 }
 0x44f   : > { %p3484_p13 = por %p3483_p9, %p3482_p12 }
 0x451   : > { %p3485_p0 = pnand %p3484_p13, %p3480_p10 }
 0x453   : > { %3488 = shalt.err (!%p3485_p0)  }
 0x454   : > { %2274 = dma.vmem_to_hbm [thread:$0]  %s2270_s18, 128, %s2272_s26, [#allocation8 + $0x1]  ;;  %vm2243_vm13 = vcmask 0  }
 0x4b1   : > { %v2059_v55 = vpop.xlane.xlu1 %2058 }
 0x4b3   : > { %v2068_v59 = vpop.xlane.xlu2 %2067 }
 0x4b4   : > { %v2069_v61 = vadd.f32 %v2068_v59, %v2059_v55 }
 0x4b6   : > { %v2070_v62 = vrot.slane %v2069_v61, 4  ;;  %v2224_v0 = vpop.xlane.xlu0 %2223 }
 0x4b8   : > { %v2071_v63 = vadd.f32 %v2070_v62, %v2069_v61 }
 0x4b9   : > { %v2233_v2 = vpop.xlane.xlu1 %2232 }
 0x4ba   : > { %v2072_v1 = vrot.slane %v2071_v63, 2  ;;  %v2234_v3 = vadd.f32 %v2233_v2, %v2224_v0 }
 0x4bc   : > { %v2073_v40 = vadd.f32 %v2072_v1, %v2071_v63  ;;  %v2235_v4 = vrot.slane %v2234_v3, 4 }
 0x4be   : > { %v2236_v5 = vadd.f32 %v2235_v4, %v2234_v3  ;;  %v2074_v6 = vrot.slane %v2073_v40, 1 }
 0x4c0   : > { %v2237_v7 = vrot.slane %v2236_v5, 2  ;;  %v2075_v9 = vadd.f32 %v2074_v6, %v2073_v40 }
 0x4c2   : > { %v2238_v8 = vadd.f32 %v2237_v7, %v2236_v5  ;;  %v2076_v12 = vmul.f32 0.125, %v2075_v9 }
 0x4c4   : > { %v2239_v10 = vrot.slane %v2238_v8, 1 }
 0x4c6   : > { %v2240_v11 = vadd.f32 %v2239_v10, %v2238_v8 }
 0x4c8   : > { %v2241_v13 = vmul.f32 0.125, %v2240_v11 }
 0x4ca   : > { %v2242_v14 = vadd.f32 %v2241_v13, %v2076_v12 }
 0x4cc   : > { %2244 = vst.msk [vmem:[#allocation15] sm:$0x1] %vm2243_vm13, %v2242_v14 }
 0x4cd   : > { %3545 = dma.done.wait [#allocation8], 128 }
 0x4ce   : > { %3546 = vsyncadd [#allocation8], 4294967168 }
 0x4cf   : > { %3547 = dma.done.wait [#allocation8 + $0x1], 128 }
 0x4d0   : > { %3548 = vsyncadd [#allocation8 + $0x1], 4294967168 }
 0x4d1 PF: > { %p3249_p1 = scmp.eq.s32.totalorder %s3655_s7, 2  ;;  %s3577_s23 = smov [#allocation15]  }
 0x4d2   : > { %s2286_s24 = sshll.u32 %s3577_s23, 4  ;;  %s2288_s27 = sshll.u32 %s4164_s8, 4  ;;  %s2287_s24 = int_to_ptr.vmem [resolvable:$true] %s2286_s24  ;;  %s2289_s27 = int_to_ptr.hbm [resolvable:$true] %s2288_s27 }
 0x4d3   : > { %3238 = dma.vmem_to_hbm [thread:$0]  (%p3249_p1), %s2287_s24, 16, %s2289_s27, [#allocation12]  }
 0x4d4   : > { %3550 = dma.done.wait (%p3249_p1), [#allocation12], 16  }
 0x4d5   : > { %3552 = vsyncadd (%p3249_p1), [#allocation12], 4294967280 }
 0x4d6 PF: > { %s4182_s18 = sld [smem:[#allocation34_spill]]  ;;  %s4185_s15 = smov %s3559_s16 }
 0x4d7   : > { %s4183_s20 = sld [smem:[#allocation33_spill]] }
 0x4d8   : > { %s4184_s17 = sld [smem:[#allocation35_spill]] }
 0x4dc   : > { %p26_p8 = scmp.ge.s32.totalorder %s4182_s18, 5  }
 0x4dd   : > { %s4186_s16 = smov %s4183_s20 }
 0x4de   :  { %28 = sbr.rel (!%p26_p8) target bundleno = 9 (0x9), region = 131 }
 0x4e3   :  { %2302 = vsyncpa [#allocation11], 1 }
 0x4e4   :  { %2304 = vsyncpa [#allocation11 + $0x1], 1 }
 0x4e5   :  { %2305 = vsyncpa [#allocation14], 1 }
 0x4e6   :  { %2307 = vsyncpa [#allocation14 + $0x1], 1 }
 0x4e7   :  { %2308 = vsyncpa [#allocation12], 1 }
 0x4e8   :  { %2310 = vsyncpa [#allocation12 + $0x1], 1 }
 0x4e9   :  { %2311 = vsyncmov [#allocation7] }
 0x4ec   :  { %s2312_s7 = vpop.sfrf %2311 }
 0x4ed   :  { %p3063_p11 = scmp.ne.s32.totalorder %s2312_s7, 0 }
 0x4ef   :  { %2316 = shalt.err (%p3063_p11)  }
 0x4f0   :  { %2318 = vsyncmov [#allocation7 + $0x1] }
 0x4f3   :  { %s2319_s25 = vpop.sfrf %2318 }
 0x4f4   :  { %p3064_p7 = scmp.ne.s32.totalorder %s2319_s25, 0 }
 0x4f6   :  { %2323 = shalt.err (%p3064_p7)  }
 0x4f7   :  { %2324 = vsyncmov [#allocation8] }
 0x4fa   :  { %s2325_s30 = vpop.sfrf %2324 }
 0x4fb   :  { %p3065_p2 = scmp.ne.s32.totalorder %s2325_s30, 0 }
 0x4fd   :  { %2329 = shalt.err (%p3065_p2)  }
 0x4fe   :  { %2331 = vsyncmov [#allocation8 + $0x1] }
 0x501   :  { %s2332_s29 = vpop.sfrf %2331 }
 0x502   :  { %p3066_p3 = scmp.ne.s32.totalorder %s2332_s29, 0 }
 0x504   :  { %2336 = shalt.err (%p3066_p3)  }

</bundles_post_ra>
